<compile_context>
chip_gen: v5e
topology: v5e:2x2
jax: 0.10.0
libtpu: 0.0.40
codegen_flags: <defaults>
</compile_context>

<pallas_src>
import functools

import jax
import jax.numpy as jnp
from jax.experimental import pallas as pl
from jax.experimental.pallas import tpu as pltpu


# -----------------------------------------------------------------------------
# Fused kernel: LSTM1 -> LSTM2 -> Linear, all in VMEM.
# Gate order follows PyTorch: [i, f, g, o]; biases are b_ih + b_hh (combined).
# -----------------------------------------------------------------------------
def _fused_lstm2_linear_kernel(x_ref,          # (B, S, In)
                               wih1_ref,       # (In, 4*H1)
                               whh1_ref,       # (H1, 4*H1)
                               b1_ref,         # (1, 4*H1)
                               wih2_ref,       # (H1, 4*H2)
                               whh2_ref,       # (H2, 4*H2)
                               b2_ref,         # (1, 4*H2)
                               wln_ref,        # (S, H2, OutP)  lane-padded head weight
                               bln_ref,        # (1, OutP)
                               out_ref,        # (B, output_size)
                               h1_scr):        # VMEM (S*B, H1) time-major stash
    B, S, _ = x_ref.shape
    H1 = whh1_ref.shape[0]
    H2 = whh2_ref.shape[0]
    out_dim = out_ref.shape[1]

    # Load small operands once; they stay in vregs/VMEM across the unrolled loops.
    x = x_ref[...]          # (B, S, In)
    wih1 = wih1_ref[...]
    whh1 = whh1_ref[...]
    b1 = b1_ref[...]
    whh2 = whh2_ref[...]

    # ---------------- Layer 1 recurrence (fully unrolled over S) ----------------
    h1 = jnp.zeros((B, H1), jnp.float32)
    c1 = jnp.zeros((B, H1), jnp.float32)
    for t in range(S):
        x_t = x[:, t, :]                                                 # (B, In)
        gates = (jnp.dot(x_t, wih1, preferred_element_type=jnp.float32)
                 + jnp.dot(h1, whh1, preferred_element_type=jnp.float32)
                 + b1)                                                   # (B, 4*H1)
        i_g = jax.nn.sigmoid(gates[:, 0 * H1:1 * H1])
        f_g = jax.nn.sigmoid(gates[:, 1 * H1:2 * H1])
        g_g = jnp.tanh(gates[:, 2 * H1:3 * H1])
        o_g = jax.nn.sigmoid(gates[:, 3 * H1:4 * H1])
        c1 = f_g * c1 + i_g * g_g
        h1 = o_g * jnp.tanh(c1)
        # Stash time-major: rows [t*B, (t+1)*B) hold h1 at step t.
        h1_scr[t * B:(t + 1) * B, :] = h1

    # ------ Layer 2 input projection hoisted: one matmul for all timesteps ------
    xproj2 = (jnp.dot(h1_scr[...], wih2_ref[...],
                      preferred_element_type=jnp.float32)
              + b2_ref[...])                                             # (S*B, 4*H2)

    # ------------- Layer 2 recurrence with the Linear head folded in ------------
    h2 = jnp.zeros((B, H2), jnp.float32)
    c2 = jnp.zeros((B, H2), jnp.float32)
    acc = jnp.zeros((B, bln_ref.shape[1]), jnp.float32)                  # lane-dense
    for t in range(S):
        gates = (xproj2[t * B:(t + 1) * B, :]
                 + jnp.dot(h2, whh2, preferred_element_type=jnp.float32))  # (B, 4*H2)
        i_g = jax.nn.sigmoid(gates[:, 0 * H2:1 * H2])
        f_g = jax.nn.sigmoid(gates[:, 1 * H2:2 * H2])
        g_g = jnp.tanh(gates[:, 2 * H2:3 * H2])
        o_g = jax.nn.sigmoid(gates[:, 3 * H2:4 * H2])
        c2 = f_g * c2 + i_g * g_g
        h2 = o_g * jnp.tanh(c2)
        # Head folded in:  flat[:, t*H2:(t+1)*H2] @ W[t*H2:(t+1)*H2, :]
        acc = acc + jnp.dot(h2, wln_ref[t], preferred_element_type=jnp.float32)

    out_ref[...] = (acc + bln_ref[...])[:, :out_dim]


@functools.partial(jax.jit, static_argnames=("output_size",))
def sequential_model_forward(x_bsf, params, *, output_size):
    """x_bsf: (B, S, input_size), batch_first=True (native PyTorch layout, no transposes)."""
    B, S, _ = x_bsf.shape
    H1 = params["whh1"].shape[0]
    return pl.pallas_call(
        _fused_lstm2_linear_kernel,
        out_shape=jax.ShapeDtypeStruct((B, output_size), jnp.float32),
        scratch_shapes=[pltpu.VMEM((S * B, H1), jnp.float32)],
    )(x_bsf,
      params["wih1"], params["whh1"], params["b1"],
      params["wih2"], params["whh2"], params["b2"],
      params["w_ln"], params["b_ln"])


# -----------------------------------------------------------------------------
# Parameter init, mimicking PyTorch's uniform(-1/sqrt(fan), 1/sqrt(fan)), stored
# directly in kernel-ready layouts (transposed weights, combined biases,
# head weight reshaped to (S, 2H, OutP) with zero lane padding).
# -----------------------------------------------------------------------------
def init_params(key, seq_len, input_size, hidden_size, output_size):
    h1, h2 = hidden_size, hidden_size * 2
    ks = jax.random.split(key, 10)

    def u(k, shape, bound):
        return jax.random.uniform(k, shape, jnp.float32, -bound, bound)

    s1 = 1.0 / jnp.sqrt(h1)
    s2 = 1.0 / jnp.sqrt(h2)
    d_in_ln = h2 * seq_len
    s3 = 1.0 / jnp.sqrt(d_in_ln)
    out_p = ((output_size + 127) // 128) * 128

    w_ln = u(ks[8], (d_in_ln, output_size), s3)        # Linear weight, stored transposed
    b_ln = u(ks[9], (1, output_size), s3)
    w_ln = jnp.pad(w_ln.reshape(seq_len, h2, output_size),
                   ((0, 0), (0, 0), (0, out_p - output_size)))
    b_ln = jnp.pad(b_ln, ((0, 0), (0, out_p - output_size)))

    return {
        # LSTM 1: W_ih (4H1, In) / W_hh (4H1, H1) stored transposed; biases combined.
        "wih1": u(ks[0], (input_size, 4 * h1), s1),
        "whh1": u(ks[1], (h1, 4 * h1), s1),
        "b1":   u(ks[2], (1, 4 * h1), s1) + u(ks[3], (1, 4 * h1), s1),
        # LSTM 2
        "wih2": u(ks[4], (h1, 4 * h2), s2),
        "whh2": u(ks[5], (h2, 4 * h2), s2),
        "b2":   u(ks[6], (1, 4 * h2), s2) + u(ks[7], (1, 4 * h2), s2),
        # Linear head (kernel layout).
        "w_ln": w_ln,
        "b_ln": b_ln,
    }


# -----------------------------------------------------------------------------
# Pure-JAX reference (for correctness check only).
# -----------------------------------------------------------------------------
def _reference_forward(x_bsf, params, output_size):
    hp = jax.lax.Precision.HIGHEST

    def lstm(xs_sbf, wih, whh, b):
        Bn = xs_sbf.shape[1]
        H = whh.shape[0]

        def step(carry, x_t):
            h, c = carry
            g = (jnp.dot(x_t, wih, precision=hp)
                 + jnp.dot(h, whh, precision=hp) + b)
            i, f, gg, o = jnp.split(g, 4, axis=1)
            c = jax.nn.sigmoid(f) * c + jax.nn.sigmoid(i) * jnp.tanh(gg)
            h = jax.nn.sigmoid(o) * jnp.tanh(c)
            return (h, c), h

        h0 = jnp.zeros((Bn, H), jnp.float32)
        (_, _), hs = jax.lax.scan(step, (h0, h0), xs_sbf)
        return hs                                        # (S, B, H)

    B, S, _ = x_bsf.shape
    x_sbf = jnp.transpose(x_bsf, (1, 0, 2))
    h1 = lstm(x_sbf, params["wih1"], params["whh1"], params["b1"])
    h2 = lstm(h1, params["wih2"], params["whh2"], params["b2"])
    flat = jnp.transpose(h2, (1, 0, 2)).reshape(B, -1)   # (B, S*2H), PyTorch flatten order
    w = params["w_ln"][..., :output_size].reshape(flat.shape[1], output_size)
    b = params["b_ln"][:, :output_size]
    return jnp.dot(flat, w, precision=hp) + b


if __name__ == "__main__":
    batch = 2
    seq_len = 8
    input_size = 16
    hidden_size = 32
    output_size = 10

    key = jax.random.PRNGKey(0)
    k_x, k_p = jax.random.split(key)

    x = jax.random.normal(k_x, (batch, seq_len, input_size), jnp.float32)
    params = init_params(k_p, seq_len, input_size, hidden_size, output_size)

    out = sequential_model_forward(x, params, output_size=output_size)
    jax.block_until_ready(out)

    assert out.shape == (batch, output_size), out.shape
    assert jnp.all(jnp.isfinite(out))

    ref = _reference_forward(x, params, output_size)
    err = float(jnp.max(jnp.abs(out - ref)))
    tol = 2e-3 + 2e-2 * float(jnp.max(jnp.abs(ref)))
    assert err < tol, f"mismatch vs reference: max abs err {err} (tol {tol})"

    print("KERNEL_OK")
</pallas_src>

<mosaic_0001>
module attributes {stable_mosaic.version = 11 : i64} {
  func.func @_fused_lstm2_linear_kernel(%arg0: memref<2x8x16xf32, #tpu.memory_space<vmem>>, %arg1: memref<16x128xf32, #tpu.memory_space<vmem>>, %arg2: memref<32x128xf32, #tpu.memory_space<vmem>>, %arg3: memref<1x128xf32, #tpu.memory_space<vmem>>, %arg4: memref<32x256xf32, #tpu.memory_space<vmem>>, %arg5: memref<64x256xf32, #tpu.memory_space<vmem>>, %arg6: memref<1x256xf32, #tpu.memory_space<vmem>>, %arg7: memref<8x64x128xf32, #tpu.memory_space<vmem>>, %arg8: memref<1x128xf32, #tpu.memory_space<vmem>>, %arg9: memref<2x10xf32, #tpu.memory_space<vmem>>, %arg10: memref<16x32xf32, #tpu.memory_space<vmem>>) attributes {dimension_semantics = [], scalar_prefetch = 0 : i64, scratch_operands = 1 : i64, tpu.core_type = #tpu.core_type<tc>} {
    %c0 = arith.constant 0 : index
    %c0_0 = arith.constant 0 : index
    %c0_1 = arith.constant 0 : index
    %0 = vector.load %arg0[%c0, %c0_0, %c0_1] : memref<2x8x16xf32, #tpu.memory_space<vmem>>, vector<2x8x16xf32>
    %c0_2 = arith.constant 0 : index
    %c0_3 = arith.constant 0 : index
    %1 = vector.load %arg1[%c0_2, %c0_3] : memref<16x128xf32, #tpu.memory_space<vmem>>, vector<16x128xf32>
    %c0_4 = arith.constant 0 : index
    %c0_5 = arith.constant 0 : index
    %2 = vector.load %arg2[%c0_4, %c0_5] : memref<32x128xf32, #tpu.memory_space<vmem>>, vector<32x128xf32>
    %c0_6 = arith.constant 0 : index
    %c0_7 = arith.constant 0 : index
    %3 = vector.load %arg3[%c0_6, %c0_7] : memref<1x128xf32, #tpu.memory_space<vmem>>, vector<1x128xf32>
    %c0_8 = arith.constant 0 : index
    %c0_9 = arith.constant 0 : index
    %4 = vector.load %arg5[%c0_8, %c0_9] : memref<64x256xf32, #tpu.memory_space<vmem>>, vector<64x256xf32>
    %cst = arith.constant 0.000000e+00 : f32
    %5 = vector.broadcast %cst : f32 to vector<2x32xf32>
    %cst_10 = arith.constant 0.000000e+00 : f32
    %6 = vector.broadcast %cst_10 : f32 to vector<2x32xf32>
    %7 = vector.extract_strided_slice %0 {offsets = [0, 0, 0], sizes = [2, 1, 16], strides = [1, 1, 1]} : vector<2x8x16xf32> to vector<2x1x16xf32>
    %8 = vector.shape_cast %7 : vector<2x1x16xf32> to vector<2x16xf32>
    %cst_11 = arith.constant dense<0.000000e+00> : vector<2x128xf32>
    %9 = tpu.matmul %8, %1, %cst_11 {dimension_numbers = #tpu.dot_dimension_numbers<[1], [0], [0], [1], [0, 0, 1, 1], [], []>} : vector<2x16xf32>, vector<16x128xf32>, vector<2x128xf32> -> vector<2x128xf32>
    %cst_12 = arith.constant dense<0.000000e+00> : vector<2x128xf32>
    %10 = tpu.matmul %5, %2, %cst_12 {dimension_numbers = #tpu.dot_dimension_numbers<[1], [0], [0], [1], [0, 0, 1, 1], [], []>} : vector<2x32xf32>, vector<32x128xf32>, vector<2x128xf32> -> vector<2x128xf32>
    %11 = arith.addf %9, %10 : vector<2x128xf32>
    %12 = vector.broadcast %3 : vector<1x128xf32> to vector<2x128xf32>
    %13 = arith.addf %11, %12 : vector<2x128xf32>
    %14 = vector.extract_strided_slice %13 {offsets = [0, 0], sizes = [2, 32], strides = [1, 1]} : vector<2x128xf32> to vector<2x32xf32>
    %15 = arith.negf %14 : vector<2x32xf32>
    %16 = math.exp %15 : vector<2x32xf32>
    %cst_13 = arith.constant 1.000000e+00 : f32
    %17 = vector.broadcast %cst_13 : f32 to vector<2x32xf32>
    %18 = arith.addf %17, %16 : vector<2x32xf32>
    %19 = arith.divf %17, %18 : vector<2x32xf32>
    %20 = vector.extract_strided_slice %13 {offsets = [0, 32], sizes = [2, 32], strides = [1, 1]} : vector<2x128xf32> to vector<2x32xf32>
    %21 = arith.negf %20 : vector<2x32xf32>
    %22 = math.exp %21 : vector<2x32xf32>
    %cst_14 = arith.constant 1.000000e+00 : f32
    %23 = vector.broadcast %cst_14 : f32 to vector<2x32xf32>
    %24 = arith.addf %23, %22 : vector<2x32xf32>
    %25 = arith.divf %23, %24 : vector<2x32xf32>
    %26 = vector.extract_strided_slice %13 {offsets = [0, 64], sizes = [2, 32], strides = [1, 1]} : vector<2x128xf32> to vector<2x32xf32>
    %27 = math.tanh %26 : vector<2x32xf32>
    %28 = vector.extract_strided_slice %13 {offsets = [0, 96], sizes = [2, 32], strides = [1, 1]} : vector<2x128xf32> to vector<2x32xf32>
    %29 = arith.negf %28 : vector<2x32xf32>
    %30 = math.exp %29 : vector<2x32xf32>
    %cst_15 = arith.constant 1.000000e+00 : f32
    %31 = vector.broadcast %cst_15 : f32 to vector<2x32xf32>
    %32 = arith.addf %31, %30 : vector<2x32xf32>
    %33 = arith.divf %31, %32 : vector<2x32xf32>
    %34 = arith.mulf %25, %6 : vector<2x32xf32>
    %35 = arith.mulf %19, %27 : vector<2x32xf32>
    %36 = arith.addf %34, %35 : vector<2x32xf32>
    %37 = math.tanh %36 : vector<2x32xf32>
    %38 = arith.mulf %33, %37 : vector<2x32xf32>
    %c0_16 = arith.constant 0 : index
    %c0_17 = arith.constant 0 : index
    %39 = vector.load %arg10[%c0_16, %c0_17] : memref<16x32xf32, #tpu.memory_space<vmem>>, vector<2x32xf32>
    tpu.vector_store %arg10[%c0_16, %c0_17], %38 {strides = array<i32>} : memref<16x32xf32, #tpu.memory_space<vmem>>, vector<2x32xf32>,
    %40 = vector.extract_strided_slice %0 {offsets = [0, 1, 0], sizes = [2, 1, 16], strides = [1, 1, 1]} : vector<2x8x16xf32> to vector<2x1x16xf32>
    %41 = vector.shape_cast %40 : vector<2x1x16xf32> to vector<2x16xf32>
    %cst_18 = arith.constant dense<0.000000e+00> : vector<2x128xf32>
    %42 = tpu.matmul %41, %1, %cst_18 {dimension_numbers = #tpu.dot_dimension_numbers<[1], [0], [0], [1], [0, 0, 1, 1], [], []>} : vector<2x16xf32>, vector<16x128xf32>, vector<2x128xf32> -> vector<2x128xf32>
    %cst_19 = arith.constant dense<0.000000e+00> : vector<2x128xf32>
    %43 = tpu.matmul %38, %2, %cst_19 {dimension_numbers = #tpu.dot_dimension_numbers<[1], [0], [0], [1], [0, 0, 1, 1], [], []>} : vector<2x32xf32>, vector<32x128xf32>, vector<2x128xf32> -> vector<2x128xf32>
    %44 = arith.addf %42, %43 : vector<2x128xf32>
    %45 = vector.broadcast %3 : vector<1x128xf32> to vector<2x128xf32>
    %46 = arith.addf %44, %45 : vector<2x128xf32>
    %47 = vector.extract_strided_slice %46 {offsets = [0, 0], sizes = [2, 32], strides = [1, 1]} : vector<2x128xf32> to vector<2x32xf32>
    %48 = arith.negf %47 : vector<2x32xf32>
    %49 = math.exp %48 : vector<2x32xf32>
    %cst_20 = arith.constant 1.000000e+00 : f32
    %50 = vector.broadcast %cst_20 : f32 to vector<2x32xf32>
    %51 = arith.addf %50, %49 : vector<2x32xf32>
    %52 = arith.divf %50, %51 : vector<2x32xf32>
    %53 = vector.extract_strided_slice %46 {offsets = [0, 32], sizes = [2, 32], strides = [1, 1]} : vector<2x128xf32> to vector<2x32xf32>
    %54 = arith.negf %53 : vector<2x32xf32>
    %55 = math.exp %54 : vector<2x32xf32>
    %cst_21 = arith.constant 1.000000e+00 : f32
    %56 = vector.broadcast %cst_21 : f32 to vector<2x32xf32>
    %57 = arith.addf %56, %55 : vector<2x32xf32>
    %58 = arith.divf %56, %57 : vector<2x32xf32>
    %59 = vector.extract_strided_slice %46 {offsets = [0, 64], sizes = [2, 32], strides = [1, 1]} : vector<2x128xf32> to vector<2x32xf32>
    %60 = math.tanh %59 : vector<2x32xf32>
    %61 = vector.extract_strided_slice %46 {offsets = [0, 96], sizes = [2, 32], strides = [1, 1]} : vector<2x128xf32> to vector<2x32xf32>
    %62 = arith.negf %61 : vector<2x32xf32>
    %63 = math.exp %62 : vector<2x32xf32>
    %cst_22 = arith.constant 1.000000e+00 : f32
    %64 = vector.broadcast %cst_22 : f32 to vector<2x32xf32>
    %65 = arith.addf %64, %63 : vector<2x32xf32>
    %66 = arith.divf %64, %65 : vector<2x32xf32>
    %67 = arith.mulf %58, %36 : vector<2x32xf32>
    %68 = arith.mulf %52, %60 : vector<2x32xf32>
    %69 = arith.addf %67, %68 : vector<2x32xf32>
    %70 = math.tanh %69 : vector<2x32xf32>
    %71 = arith.mulf %66, %70 : vector<2x32xf32>
    %c2 = arith.constant 2 : index
    %c0_23 = arith.constant 0 : index
    %72 = vector.load %arg10[%c2, %c0_23] : memref<16x32xf32, #tpu.memory_space<vmem>>, vector<2x32xf32>
    tpu.vector_store %arg10[%c2, %c0_23], %71 {strides = array<i32>} : memref<16x32xf32, #tpu.memory_space<vmem>>, vector<2x32xf32>,
    %73 = vector.extract_strided_slice %0 {offsets = [0, 2, 0], sizes = [2, 1, 16], strides = [1, 1, 1]} : vector<2x8x16xf32> to vector<2x1x16xf32>
    %74 = vector.shape_cast %73 : vector<2x1x16xf32> to vector<2x16xf32>
    %cst_24 = arith.constant dense<0.000000e+00> : vector<2x128xf32>
    %75 = tpu.matmul %74, %1, %cst_24 {dimension_numbers = #tpu.dot_dimension_numbers<[1], [0], [0], [1], [0, 0, 1, 1], [], []>} : vector<2x16xf32>, vector<16x128xf32>, vector<2x128xf32> -> vector<2x128xf32>
    %cst_25 = arith.constant dense<0.000000e+00> : vector<2x128xf32>
    %76 = tpu.matmul %71, %2, %cst_25 {dimension_numbers = #tpu.dot_dimension_numbers<[1], [0], [0], [1], [0, 0, 1, 1], [], []>} : vector<2x32xf32>, vector<32x128xf32>, vector<2x128xf32> -> vector<2x128xf32>
    %77 = arith.addf %75, %76 : vector<2x128xf32>
    %78 = vector.broadcast %3 : vector<1x128xf32> to vector<2x128xf32>
    %79 = arith.addf %77, %78 : vector<2x128xf32>
    %80 = vector.extract_strided_slice %79 {offsets = [0, 0], sizes = [2, 32], strides = [1, 1]} : vector<2x128xf32> to vector<2x32xf32>
    %81 = arith.negf %80 : vector<2x32xf32>
    %82 = math.exp %81 : vector<2x32xf32>
    %cst_26 = arith.constant 1.000000e+00 : f32
    %83 = vector.broadcast %cst_26 : f32 to vector<2x32xf32>
    %84 = arith.addf %83, %82 : vector<2x32xf32>
    %85 = arith.divf %83, %84 : vector<2x32xf32>
    %86 = vector.extract_strided_slice %79 {offsets = [0, 32], sizes = [2, 32], strides = [1, 1]} : vector<2x128xf32> to vector<2x32xf32>
    %87 = arith.negf %86 : vector<2x32xf32>
    %88 = math.exp %87 : vector<2x32xf32>
    %cst_27 = arith.constant 1.000000e+00 : f32
    %89 = vector.broadcast %cst_27 : f32 to vector<2x32xf32>
    %90 = arith.addf %89, %88 : vector<2x32xf32>
    %91 = arith.divf %89, %90 : vector<2x32xf32>
    %92 = vector.extract_strided_slice %79 {offsets = [0, 64], sizes = [2, 32], strides = [1, 1]} : vector<2x128xf32> to vector<2x32xf32>
    %93 = math.tanh %92 : vector<2x32xf32>
    %94 = vector.extract_strided_slice %79 {offsets = [0, 96], sizes = [2, 32], strides = [1, 1]} : vector<2x128xf32> to vector<2x32xf32>
    %95 = arith.negf %94 : vector<2x32xf32>
    %96 = math.exp %95 : vector<2x32xf32>
    %cst_28 = arith.constant 1.000000e+00 : f32
    %97 = vector.broadcast %cst_28 : f32 to vector<2x32xf32>
    %98 = arith.addf %97, %96 : vector<2x32xf32>
    %99 = arith.divf %97, %98 : vector<2x32xf32>
    %100 = arith.mulf %91, %69 : vector<2x32xf32>
    %101 = arith.mulf %85, %93 : vector<2x32xf32>
    %102 = arith.addf %100, %101 : vector<2x32xf32>
    %103 = math.tanh %102 : vector<2x32xf32>
    %104 = arith.mulf %99, %103 : vector<2x32xf32>
    %c4 = arith.constant 4 : index
    %c0_29 = arith.constant 0 : index
    %105 = vector.load %arg10[%c4, %c0_29] : memref<16x32xf32, #tpu.memory_space<vmem>>, vector<2x32xf32>
    tpu.vector_store %arg10[%c4, %c0_29], %104 {strides = array<i32>} : memref<16x32xf32, #tpu.memory_space<vmem>>, vector<2x32xf32>,
    %106 = vector.extract_strided_slice %0 {offsets = [0, 3, 0], sizes = [2, 1, 16], strides = [1, 1, 1]} : vector<2x8x16xf32> to vector<2x1x16xf32>
    %107 = vector.shape_cast %106 : vector<2x1x16xf32> to vector<2x16xf32>
    %cst_30 = arith.constant dense<0.000000e+00> : vector<2x128xf32>
    %108 = tpu.matmul %107, %1, %cst_30 {dimension_numbers = #tpu.dot_dimension_numbers<[1], [0], [0], [1], [0, 0, 1, 1], [], []>} : vector<2x16xf32>, vector<16x128xf32>, vector<2x128xf32> -> vector<2x128xf32>
    %cst_31 = arith.constant dense<0.000000e+00> : vector<2x128xf32>
    %109 = tpu.matmul %104, %2, %cst_31 {dimension_numbers = #tpu.dot_dimension_numbers<[1], [0], [0], [1], [0, 0, 1, 1], [], []>} : vector<2x32xf32>, vector<32x128xf32>, vector<2x128xf32> -> vector<2x128xf32>
    %110 = arith.addf %108, %109 : vector<2x128xf32>
    %111 = vector.broadcast %3 : vector<1x128xf32> to vector<2x128xf32>
    %112 = arith.addf %110, %111 : vector<2x128xf32>
    %113 = vector.extract_strided_slice %112 {offsets = [0, 0], sizes = [2, 32], strides = [1, 1]} : vector<2x128xf32> to vector<2x32xf32>
    %114 = arith.negf %113 : vector<2x32xf32>
    %115 = math.exp %114 : vector<2x32xf32>
    %cst_32 = arith.constant 1.000000e+00 : f32
    %116 = vector.broadcast %cst_32 : f32 to vector<2x32xf32>
    %117 = arith.addf %116, %115 : vector<2x32xf32>
    %118 = arith.divf %116, %117 : vector<2x32xf32>
    %119 = vector.extract_strided_slice %112 {offsets = [0, 32], sizes = [2, 32], strides = [1, 1]} : vector<2x128xf32> to vector<2x32xf32>
    %120 = arith.negf %119 : vector<2x32xf32>
    %121 = math.exp %120 : vector<2x32xf32>
    %cst_33 = arith.constant 1.000000e+00 : f32
    %122 = vector.broadcast %cst_33 : f32 to vector<2x32xf32>
    %123 = arith.addf %122, %121 : vector<2x32xf32>
    %124 = arith.divf %122, %123 : vector<2x32xf32>
    %125 = vector.extract_strided_slice %112 {offsets = [0, 64], sizes = [2, 32], strides = [1, 1]} : vector<2x128xf32> to vector<2x32xf32>
    %126 = math.tanh %125 : vector<2x32xf32>
    %127 = vector.extract_strided_slice %112 {offsets = [0, 96], sizes = [2, 32], strides = [1, 1]} : vector<2x128xf32> to vector<2x32xf32>
    %128 = arith.negf %127 : vector<2x32xf32>
    %129 = math.exp %128 : vector<2x32xf32>
    %cst_34 = arith.constant 1.000000e+00 : f32
    %130 = vector.broadcast %cst_34 : f32 to vector<2x32xf32>
    %131 = arith.addf %130, %129 : vector<2x32xf32>
    %132 = arith.divf %130, %131 : vector<2x32xf32>
    %133 = arith.mulf %124, %102 : vector<2x32xf32>
    %134 = arith.mulf %118, %126 : vector<2x32xf32>
    %135 = arith.addf %133, %134 : vector<2x32xf32>
    %136 = math.tanh %135 : vector<2x32xf32>
    %137 = arith.mulf %132, %136 : vector<2x32xf32>
    %c6 = arith.constant 6 : index
    %c0_35 = arith.constant 0 : index
    %138 = vector.load %arg10[%c6, %c0_35] : memref<16x32xf32, #tpu.memory_space<vmem>>, vector<2x32xf32>
    tpu.vector_store %arg10[%c6, %c0_35], %137 {strides = array<i32>} : memref<16x32xf32, #tpu.memory_space<vmem>>, vector<2x32xf32>,
    %139 = vector.extract_strided_slice %0 {offsets = [0, 4, 0], sizes = [2, 1, 16], strides = [1, 1, 1]} : vector<2x8x16xf32> to vector<2x1x16xf32>
    %140 = vector.shape_cast %139 : vector<2x1x16xf32> to vector<2x16xf32>
    %cst_36 = arith.constant dense<0.000000e+00> : vector<2x128xf32>
    %141 = tpu.matmul %140, %1, %cst_36 {dimension_numbers = #tpu.dot_dimension_numbers<[1], [0], [0], [1], [0, 0, 1, 1], [], []>} : vector<2x16xf32>, vector<16x128xf32>, vector<2x128xf32> -> vector<2x128xf32>
    %cst_37 = arith.constant dense<0.000000e+00> : vector<2x128xf32>
    %142 = tpu.matmul %137, %2, %cst_37 {dimension_numbers = #tpu.dot_dimension_numbers<[1], [0], [0], [1], [0, 0, 1, 1], [], []>} : vector<2x32xf32>, vector<32x128xf32>, vector<2x128xf32> -> vector<2x128xf32>
    %143 = arith.addf %141, %142 : vector<2x128xf32>
    %144 = vector.broadcast %3 : vector<1x128xf32> to vector<2x128xf32>
    %145 = arith.addf %143, %144 : vector<2x128xf32>
    %146 = vector.extract_strided_slice %145 {offsets = [0, 0], sizes = [2, 32], strides = [1, 1]} : vector<2x128xf32> to vector<2x32xf32>
    %147 = arith.negf %146 : vector<2x32xf32>
    %148 = math.exp %147 : vector<2x32xf32>
    %cst_38 = arith.constant 1.000000e+00 : f32
    %149 = vector.broadcast %cst_38 : f32 to vector<2x32xf32>
    %150 = arith.addf %149, %148 : vector<2x32xf32>
    %151 = arith.divf %149, %150 : vector<2x32xf32>
    %152 = vector.extract_strided_slice %145 {offsets = [0, 32], sizes = [2, 32], strides = [1, 1]} : vector<2x128xf32> to vector<2x32xf32>
    %153 = arith.negf %152 : vector<2x32xf32>
    %154 = math.exp %153 : vector<2x32xf32>
    %cst_39 = arith.constant 1.000000e+00 : f32
    %155 = vector.broadcast %cst_39 : f32 to vector<2x32xf32>
    %156 = arith.addf %155, %154 : vector<2x32xf32>
    %157 = arith.divf %155, %156 : vector<2x32xf32>
    %158 = vector.extract_strided_slice %145 {offsets = [0, 64], sizes = [2, 32], strides = [1, 1]} : vector<2x128xf32> to vector<2x32xf32>
    %159 = math.tanh %158 : vector<2x32xf32>
    %160 = vector.extract_strided_slice %145 {offsets = [0, 96], sizes = [2, 32], strides = [1, 1]} : vector<2x128xf32> to vector<2x32xf32>
    %161 = arith.negf %160 : vector<2x32xf32>
    %162 = math.exp %161 : vector<2x32xf32>
    %cst_40 = arith.constant 1.000000e+00 : f32
    %163 = vector.broadcast %cst_40 : f32 to vector<2x32xf32>
    %164 = arith.addf %163, %162 : vector<2x32xf32>
    %165 = arith.divf %163, %164 : vector<2x32xf32>
    %166 = arith.mulf %157, %135 : vector<2x32xf32>
    %167 = arith.mulf %151, %159 : vector<2x32xf32>
    %168 = arith.addf %166, %167 : vector<2x32xf32>
    %169 = math.tanh %168 : vector<2x32xf32>
    %170 = arith.mulf %165, %169 : vector<2x32xf32>
    %c8 = arith.constant 8 : index
    %c0_41 = arith.constant 0 : index
    %171 = vector.load %arg10[%c8, %c0_41] : memref<16x32xf32, #tpu.memory_space<vmem>>, vector<2x32xf32>
    tpu.vector_store %arg10[%c8, %c0_41], %170 {strides = array<i32>} : memref<16x32xf32, #tpu.memory_space<vmem>>, vector<2x32xf32>,
    %172 = vector.extract_strided_slice %0 {offsets = [0, 5, 0], sizes = [2, 1, 16], strides = [1, 1, 1]} : vector<2x8x16xf32> to vector<2x1x16xf32>
    %173 = vector.shape_cast %172 : vector<2x1x16xf32> to vector<2x16xf32>
    %cst_42 = arith.constant dense<0.000000e+00> : vector<2x128xf32>
    %174 = tpu.matmul %173, %1, %cst_42 {dimension_numbers = #tpu.dot_dimension_numbers<[1], [0], [0], [1], [0, 0, 1, 1], [], []>} : vector<2x16xf32>, vector<16x128xf32>, vector<2x128xf32> -> vector<2x128xf32>
    %cst_43 = arith.constant dense<0.000000e+00> : vector<2x128xf32>
    %175 = tpu.matmul %170, %2, %cst_43 {dimension_numbers = #tpu.dot_dimension_numbers<[1], [0], [0], [1], [0, 0, 1, 1], [], []>} : vector<2x32xf32>, vector<32x128xf32>, vector<2x128xf32> -> vector<2x128xf32>
    %176 = arith.addf %174, %175 : vector<2x128xf32>
    %177 = vector.broadcast %3 : vector<1x128xf32> to vector<2x128xf32>
    %178 = arith.addf %176, %177 : vector<2x128xf32>
    %179 = vector.extract_strided_slice %178 {offsets = [0, 0], sizes = [2, 32], strides = [1, 1]} : vector<2x128xf32> to vector<2x32xf32>
    %180 = arith.negf %179 : vector<2x32xf32>
    %181 = math.exp %180 : vector<2x32xf32>
    %cst_44 = arith.constant 1.000000e+00 : f32
    %182 = vector.broadcast %cst_44 : f32 to vector<2x32xf32>
    %183 = arith.addf %182, %181 : vector<2x32xf32>
    %184 = arith.divf %182, %183 : vector<2x32xf32>
    %185 = vector.extract_strided_slice %178 {offsets = [0, 32], sizes = [2, 32], strides = [1, 1]} : vector<2x128xf32> to vector<2x32xf32>
    %186 = arith.negf %185 : vector<2x32xf32>
    %187 = math.exp %186 : vector<2x32xf32>
    %cst_45 = arith.constant 1.000000e+00 : f32
    %188 = vector.broadcast %cst_45 : f32 to vector<2x32xf32>
    %189 = arith.addf %188, %187 : vector<2x32xf32>
    %190 = arith.divf %188, %189 : vector<2x32xf32>
    %191 = vector.extract_strided_slice %178 {offsets = [0, 64], sizes = [2, 32], strides = [1, 1]} : vector<2x128xf32> to vector<2x32xf32>
    %192 = math.tanh %191 : vector<2x32xf32>
    %193 = vector.extract_strided_slice %178 {offsets = [0, 96], sizes = [2, 32], strides = [1, 1]} : vector<2x128xf32> to vector<2x32xf32>
    %194 = arith.negf %193 : vector<2x32xf32>
    %195 = math.exp %194 : vector<2x32xf32>
    %cst_46 = arith.constant 1.000000e+00 : f32
    %196 = vector.broadcast %cst_46 : f32 to vector<2x32xf32>
    %197 = arith.addf %196, %195 : vector<2x32xf32>
    %198 = arith.divf %196, %197 : vector<2x32xf32>
    %199 = arith.mulf %190, %168 : vector<2x32xf32>
    %200 = arith.mulf %184, %192 : vector<2x32xf32>
    %201 = arith.addf %199, %200 : vector<2x32xf32>
    %202 = math.tanh %201 : vector<2x32xf32>
    %203 = arith.mulf %198, %202 : vector<2x32xf32>
    %c10 = arith.constant 10 : index
    %c0_47 = arith.constant 0 : index
    %204 = vector.load %arg10[%c10, %c0_47] : memref<16x32xf32, #tpu.memory_space<vmem>>, vector<2x32xf32>
    tpu.vector_store %arg10[%c10, %c0_47], %203 {strides = array<i32>} : memref<16x32xf32, #tpu.memory_space<vmem>>, vector<2x32xf32>,
    %205 = vector.extract_strided_slice %0 {offsets = [0, 6, 0], sizes = [2, 1, 16], strides = [1, 1, 1]} : vector<2x8x16xf32> to vector<2x1x16xf32>
    %206 = vector.shape_cast %205 : vector<2x1x16xf32> to vector<2x16xf32>
    %cst_48 = arith.constant dense<0.000000e+00> : vector<2x128xf32>
    %207 = tpu.matmul %206, %1, %cst_48 {dimension_numbers = #tpu.dot_dimension_numbers<[1], [0], [0], [1], [0, 0, 1, 1], [], []>} : vector<2x16xf32>, vector<16x128xf32>, vector<2x128xf32> -> vector<2x128xf32>
    %cst_49 = arith.constant dense<0.000000e+00> : vector<2x128xf32>
    %208 = tpu.matmul %203, %2, %cst_49 {dimension_numbers = #tpu.dot_dimension_numbers<[1], [0], [0], [1], [0, 0, 1, 1], [], []>} : vector<2x32xf32>, vector<32x128xf32>, vector<2x128xf32> -> vector<2x128xf32>
    %209 = arith.addf %207, %208 : vector<2x128xf32>
    %210 = vector.broadcast %3 : vector<1x128xf32> to vector<2x128xf32>
    %211 = arith.addf %209, %210 : vector<2x128xf32>
    %212 = vector.extract_strided_slice %211 {offsets = [0, 0], sizes = [2, 32], strides = [1, 1]} : vector<2x128xf32> to vector<2x32xf32>
    %213 = arith.negf %212 : vector<2x32xf32>
    %214 = math.exp %213 : vector<2x32xf32>
    %cst_50 = arith.constant 1.000000e+00 : f32
    %215 = vector.broadcast %cst_50 : f32 to vector<2x32xf32>
    %216 = arith.addf %215, %214 : vector<2x32xf32>
    %217 = arith.divf %215, %216 : vector<2x32xf32>
    %218 = vector.extract_strided_slice %211 {offsets = [0, 32], sizes = [2, 32], strides = [1, 1]} : vector<2x128xf32> to vector<2x32xf32>
    %219 = arith.negf %218 : vector<2x32xf32>
    %220 = math.exp %219 : vector<2x32xf32>
    %cst_51 = arith.constant 1.000000e+00 : f32
    %221 = vector.broadcast %cst_51 : f32 to vector<2x32xf32>
    %222 = arith.addf %221, %220 : vector<2x32xf32>
    %223 = arith.divf %221, %222 : vector<2x32xf32>
    %224 = vector.extract_strided_slice %211 {offsets = [0, 64], sizes = [2, 32], strides = [1, 1]} : vector<2x128xf32> to vector<2x32xf32>
    %225 = math.tanh %224 : vector<2x32xf32>
    %226 = vector.extract_strided_slice %211 {offsets = [0, 96], sizes = [2, 32], strides = [1, 1]} : vector<2x128xf32> to vector<2x32xf32>
    %227 = arith.negf %226 : vector<2x32xf32>
    %228 = math.exp %227 : vector<2x32xf32>
    %cst_52 = arith.constant 1.000000e+00 : f32
    %229 = vector.broadcast %cst_52 : f32 to vector<2x32xf32>
    %230 = arith.addf %229, %228 : vector<2x32xf32>
    %231 = arith.divf %229, %230 : vector<2x32xf32>
    %232 = arith.mulf %223, %201 : vector<2x32xf32>
    %233 = arith.mulf %217, %225 : vector<2x32xf32>
    %234 = arith.addf %232, %233 : vector<2x32xf32>
    %235 = math.tanh %234 : vector<2x32xf32>
    %236 = arith.mulf %231, %235 : vector<2x32xf32>
    %c12 = arith.constant 12 : index
    %c0_53 = arith.constant 0 : index
    %237 = vector.load %arg10[%c12, %c0_53] : memref<16x32xf32, #tpu.memory_space<vmem>>, vector<2x32xf32>
    tpu.vector_store %arg10[%c12, %c0_53], %236 {strides = array<i32>} : memref<16x32xf32, #tpu.memory_space<vmem>>, vector<2x32xf32>,
    %238 = vector.extract_strided_slice %0 {offsets = [0, 7, 0], sizes = [2, 1, 16], strides = [1, 1, 1]} : vector<2x8x16xf32> to vector<2x1x16xf32>
    %239 = vector.shape_cast %238 : vector<2x1x16xf32> to vector<2x16xf32>
    %cst_54 = arith.constant dense<0.000000e+00> : vector<2x128xf32>
    %240 = tpu.matmul %239, %1, %cst_54 {dimension_numbers = #tpu.dot_dimension_numbers<[1], [0], [0], [1], [0, 0, 1, 1], [], []>} : vector<2x16xf32>, vector<16x128xf32>, vector<2x128xf32> -> vector<2x128xf32>
    %cst_55 = arith.constant dense<0.000000e+00> : vector<2x128xf32>
    %241 = tpu.matmul %236, %2, %cst_55 {dimension_numbers = #tpu.dot_dimension_numbers<[1], [0], [0], [1], [0, 0, 1, 1], [], []>} : vector<2x32xf32>, vector<32x128xf32>, vector<2x128xf32> -> vector<2x128xf32>
    %242 = arith.addf %240, %241 : vector<2x128xf32>
    %243 = vector.broadcast %3 : vector<1x128xf32> to vector<2x128xf32>
    %244 = arith.addf %242, %243 : vector<2x128xf32>
    %245 = vector.extract_strided_slice %244 {offsets = [0, 0], sizes = [2, 32], strides = [1, 1]} : vector<2x128xf32> to vector<2x32xf32>
    %246 = arith.negf %245 : vector<2x32xf32>
    %247 = math.exp %246 : vector<2x32xf32>
    %cst_56 = arith.constant 1.000000e+00 : f32
    %248 = vector.broadcast %cst_56 : f32 to vector<2x32xf32>
    %249 = arith.addf %248, %247 : vector<2x32xf32>
    %250 = arith.divf %248, %249 : vector<2x32xf32>
    %251 = vector.extract_strided_slice %244 {offsets = [0, 32], sizes = [2, 32], strides = [1, 1]} : vector<2x128xf32> to vector<2x32xf32>
    %252 = arith.negf %251 : vector<2x32xf32>
    %253 = math.exp %252 : vector<2x32xf32>
    %cst_57 = arith.constant 1.000000e+00 : f32
    %254 = vector.broadcast %cst_57 : f32 to vector<2x32xf32>
    %255 = arith.addf %254, %253 : vector<2x32xf32>
    %256 = arith.divf %254, %255 : vector<2x32xf32>
    %257 = vector.extract_strided_slice %244 {offsets = [0, 64], sizes = [2, 32], strides = [1, 1]} : vector<2x128xf32> to vector<2x32xf32>
    %258 = math.tanh %257 : vector<2x32xf32>
    %259 = vector.extract_strided_slice %244 {offsets = [0, 96], sizes = [2, 32], strides = [1, 1]} : vector<2x128xf32> to vector<2x32xf32>
    %260 = arith.negf %259 : vector<2x32xf32>
    %261 = math.exp %260 : vector<2x32xf32>
    %cst_58 = arith.constant 1.000000e+00 : f32
    %262 = vector.broadcast %cst_58 : f32 to vector<2x32xf32>
    %263 = arith.addf %262, %261 : vector<2x32xf32>
    %264 = arith.divf %262, %263 : vector<2x32xf32>
    %265 = arith.mulf %256, %234 : vector<2x32xf32>
    %266 = arith.mulf %250, %258 : vector<2x32xf32>
    %267 = arith.addf %265, %266 : vector<2x32xf32>
    %268 = math.tanh %267 : vector<2x32xf32>
    %269 = arith.mulf %264, %268 : vector<2x32xf32>
    %c14 = arith.constant 14 : index
    %c0_59 = arith.constant 0 : index
    %270 = vector.load %arg10[%c14, %c0_59] : memref<16x32xf32, #tpu.memory_space<vmem>>, vector<2x32xf32>
    tpu.vector_store %arg10[%c14, %c0_59], %269 {strides = array<i32>} : memref<16x32xf32, #tpu.memory_space<vmem>>, vector<2x32xf32>,
    %c0_60 = arith.constant 0 : index
    %c0_61 = arith.constant 0 : index
    %271 = vector.load %arg10[%c0_60, %c0_61] : memref<16x32xf32, #tpu.memory_space<vmem>>, vector<16x32xf32>
    %c0_62 = arith.constant 0 : index
    %c0_63 = arith.constant 0 : index
    %272 = vector.load %arg4[%c0_62, %c0_63] : memref<32x256xf32, #tpu.memory_space<vmem>>, vector<32x256xf32>
    %cst_64 = arith.constant dense<0.000000e+00> : vector<16x256xf32>
    %273 = tpu.matmul %271, %272, %cst_64 {dimension_numbers = #tpu.dot_dimension_numbers<[1], [0], [0], [1], [0, 0, 1, 1], [], []>} : vector<16x32xf32>, vector<32x256xf32>, vector<16x256xf32> -> vector<16x256xf32>
    %c0_65 = arith.constant 0 : index
    %c0_66 = arith.constant 0 : index
    %274 = vector.load %arg6[%c0_65, %c0_66] : memref<1x256xf32, #tpu.memory_space<vmem>>, vector<1x256xf32>
    %275 = vector.broadcast %274 : vector<1x256xf32> to vector<16x256xf32>
    %276 = arith.addf %273, %275 : vector<16x256xf32>
    %cst_67 = arith.constant 0.000000e+00 : f32
    %277 = vector.broadcast %cst_67 : f32 to vector<2x64xf32>
    %cst_68 = arith.constant 0.000000e+00 : f32
    %278 = vector.broadcast %cst_68 : f32 to vector<2x64xf32>
    %cst_69 = arith.constant 0.000000e+00 : f32
    %279 = vector.broadcast %cst_69 : f32 to vector<2x128xf32>
    %280 = vector.extract_strided_slice %276 {offsets = [0, 0], sizes = [2, 256], strides = [1, 1]} : vector<16x256xf32> to vector<2x256xf32>
    %cst_70 = arith.constant dense<0.000000e+00> : vector<2x256xf32>
    %281 = tpu.matmul %277, %4, %cst_70 {dimension_numbers = #tpu.dot_dimension_numbers<[1], [0], [0], [1], [0, 0, 1, 1], [], []>} : vector<2x64xf32>, vector<64x256xf32>, vector<2x256xf32> -> vector<2x256xf32>
    %282 = arith.addf %280, %281 : vector<2x256xf32>
    %283 = vector.extract_strided_slice %282 {offsets = [0, 0], sizes = [2, 64], strides = [1, 1]} : vector<2x256xf32> to vector<2x64xf32>
    %284 = arith.negf %283 : vector<2x64xf32>
    %285 = math.exp %284 : vector<2x64xf32>
    %cst_71 = arith.constant 1.000000e+00 : f32
    %286 = vector.broadcast %cst_71 : f32 to vector<2x64xf32>
    %287 = arith.addf %286, %285 : vector<2x64xf32>
    %288 = arith.divf %286, %287 : vector<2x64xf32>
    %289 = vector.extract_strided_slice %282 {offsets = [0, 64], sizes = [2, 64], strides = [1, 1]} : vector<2x256xf32> to vector<2x64xf32>
    %290 = arith.negf %289 : vector<2x64xf32>
    %291 = math.exp %290 : vector<2x64xf32>
    %cst_72 = arith.constant 1.000000e+00 : f32
    %292 = vector.broadcast %cst_72 : f32 to vector<2x64xf32>
    %293 = arith.addf %292, %291 : vector<2x64xf32>
    %294 = arith.divf %292, %293 : vector<2x64xf32>
    %295 = vector.extract_strided_slice %282 {offsets = [0, 128], sizes = [2, 64], strides = [1, 1]} : vector<2x256xf32> to vector<2x64xf32>
    %296 = math.tanh %295 : vector<2x64xf32>
    %297 = vector.extract_strided_slice %282 {offsets = [0, 192], sizes = [2, 64], strides = [1, 1]} : vector<2x256xf32> to vector<2x64xf32>
    %298 = arith.negf %297 : vector<2x64xf32>
    %299 = math.exp %298 : vector<2x64xf32>
    %cst_73 = arith.constant 1.000000e+00 : f32
    %300 = vector.broadcast %cst_73 : f32 to vector<2x64xf32>
    %301 = arith.addf %300, %299 : vector<2x64xf32>
    %302 = arith.divf %300, %301 : vector<2x64xf32>
    %303 = arith.mulf %294, %278 : vector<2x64xf32>
    %304 = arith.mulf %288, %296 : vector<2x64xf32>
    %305 = arith.addf %303, %304 : vector<2x64xf32>
    %306 = math.tanh %305 : vector<2x64xf32>
    %307 = arith.mulf %302, %306 : vector<2x64xf32>
    %c0_74 = arith.constant 0 : index
    %c0_75 = arith.constant 0 : index
    %c0_76 = arith.constant 0 : index
    %308 = vector.load %arg7[%c0_74, %c0_75, %c0_76] : memref<8x64x128xf32, #tpu.memory_space<vmem>>, vector<1x64x128xf32>
    %309 = vector.shape_cast %308 : vector<1x64x128xf32> to vector<64x128xf32>
    %cst_77 = arith.constant dense<0.000000e+00> : vector<2x128xf32>
    %310 = tpu.matmul %307, %309, %cst_77 {dimension_numbers = #tpu.dot_dimension_numbers<[1], [0], [0], [1], [0, 0, 1, 1], [], []>} : vector<2x64xf32>, vector<64x128xf32>, vector<2x128xf32> -> vector<2x128xf32>
    %311 = arith.addf %279, %310 : vector<2x128xf32>
    %312 = vector.extract_strided_slice %276 {offsets = [2, 0], sizes = [2, 256], strides = [1, 1]} : vector<16x256xf32> to vector<2x256xf32>
    %cst_78 = arith.constant dense<0.000000e+00> : vector<2x256xf32>
    %313 = tpu.matmul %307, %4, %cst_78 {dimension_numbers = #tpu.dot_dimension_numbers<[1], [0], [0], [1], [0, 0, 1, 1], [], []>} : vector<2x64xf32>, vector<64x256xf32>, vector<2x256xf32> -> vector<2x256xf32>
    %314 = arith.addf %312, %313 : vector<2x256xf32>
    %315 = vector.extract_strided_slice %314 {offsets = [0, 0], sizes = [2, 64], strides = [1, 1]} : vector<2x256xf32> to vector<2x64xf32>
    %316 = arith.negf %315 : vector<2x64xf32>
    %317 = math.exp %316 : vector<2x64xf32>
    %cst_79 = arith.constant 1.000000e+00 : f32
    %318 = vector.broadcast %cst_79 : f32 to vector<2x64xf32>
    %319 = arith.addf %318, %317 : vector<2x64xf32>
    %320 = arith.divf %318, %319 : vector<2x64xf32>
    %321 = vector.extract_strided_slice %314 {offsets = [0, 64], sizes = [2, 64], strides = [1, 1]} : vector<2x256xf32> to vector<2x64xf32>
    %322 = arith.negf %321 : vector<2x64xf32>
    %323 = math.exp %322 : vector<2x64xf32>
    %cst_80 = arith.constant 1.000000e+00 : f32
    %324 = vector.broadcast %cst_80 : f32 to vector<2x64xf32>
    %325 = arith.addf %324, %323 : vector<2x64xf32>
    %326 = arith.divf %324, %325 : vector<2x64xf32>
    %327 = vector.extract_strided_slice %314 {offsets = [0, 128], sizes = [2, 64], strides = [1, 1]} : vector<2x256xf32> to vector<2x64xf32>
    %328 = math.tanh %327 : vector<2x64xf32>
    %329 = vector.extract_strided_slice %314 {offsets = [0, 192], sizes = [2, 64], strides = [1, 1]} : vector<2x256xf32> to vector<2x64xf32>
    %330 = arith.negf %329 : vector<2x64xf32>
    %331 = math.exp %330 : vector<2x64xf32>
    %cst_81 = arith.constant 1.000000e+00 : f32
    %332 = vector.broadcast %cst_81 : f32 to vector<2x64xf32>
    %333 = arith.addf %332, %331 : vector<2x64xf32>
    %334 = arith.divf %332, %333 : vector<2x64xf32>
    %335 = arith.mulf %326, %305 : vector<2x64xf32>
    %336 = arith.mulf %320, %328 : vector<2x64xf32>
    %337 = arith.addf %335, %336 : vector<2x64xf32>
    %338 = math.tanh %337 : vector<2x64xf32>
    %339 = arith.mulf %334, %338 : vector<2x64xf32>
    %c1 = arith.constant 1 : index
    %c0_82 = arith.constant 0 : index
    %c0_83 = arith.constant 0 : index
    %340 = vector.load %arg7[%c1, %c0_82, %c0_83] : memref<8x64x128xf32, #tpu.memory_space<vmem>>, vector<1x64x128xf32>
    %341 = vector.shape_cast %340 : vector<1x64x128xf32> to vector<64x128xf32>
    %cst_84 = arith.constant dense<0.000000e+00> : vector<2x128xf32>
    %342 = tpu.matmul %339, %341, %cst_84 {dimension_numbers = #tpu.dot_dimension_numbers<[1], [0], [0], [1], [0, 0, 1, 1], [], []>} : vector<2x64xf32>, vector<64x128xf32>, vector<2x128xf32> -> vector<2x128xf32>
    %343 = arith.addf %311, %342 : vector<2x128xf32>
    %344 = vector.extract_strided_slice %276 {offsets = [4, 0], sizes = [2, 256], strides = [1, 1]} : vector<16x256xf32> to vector<2x256xf32>
    %cst_85 = arith.constant dense<0.000000e+00> : vector<2x256xf32>
    %345 = tpu.matmul %339, %4, %cst_85 {dimension_numbers = #tpu.dot_dimension_numbers<[1], [0], [0], [1], [0, 0, 1, 1], [], []>} : vector<2x64xf32>, vector<64x256xf32>, vector<2x256xf32> -> vector<2x256xf32>
    %346 = arith.addf %344, %345 : vector<2x256xf32>
    %347 = vector.extract_strided_slice %346 {offsets = [0, 0], sizes = [2, 64], strides = [1, 1]} : vector<2x256xf32> to vector<2x64xf32>
    %348 = arith.negf %347 : vector<2x64xf32>
    %349 = math.exp %348 : vector<2x64xf32>
    %cst_86 = arith.constant 1.000000e+00 : f32
    %350 = vector.broadcast %cst_86 : f32 to vector<2x64xf32>
    %351 = arith.addf %350, %349 : vector<2x64xf32>
    %352 = arith.divf %350, %351 : vector<2x64xf32>
    %353 = vector.extract_strided_slice %346 {offsets = [0, 64], sizes = [2, 64], strides = [1, 1]} : vector<2x256xf32> to vector<2x64xf32>
    %354 = arith.negf %353 : vector<2x64xf32>
    %355 = math.exp %354 : vector<2x64xf32>
    %cst_87 = arith.constant 1.000000e+00 : f32
    %356 = vector.broadcast %cst_87 : f32 to vector<2x64xf32>
    %357 = arith.addf %356, %355 : vector<2x64xf32>
    %358 = arith.divf %356, %357 : vector<2x64xf32>
    %359 = vector.extract_strided_slice %346 {offsets = [0, 128], sizes = [2, 64], strides = [1, 1]} : vector<2x256xf32> to vector<2x64xf32>
    %360 = math.tanh %359 : vector<2x64xf32>
    %361 = vector.extract_strided_slice %346 {offsets = [0, 192], sizes = [2, 64], strides = [1, 1]} : vector<2x256xf32> to vector<2x64xf32>
    %362 = arith.negf %361 : vector<2x64xf32>
    %363 = math.exp %362 : vector<2x64xf32>
    %cst_88 = arith.constant 1.000000e+00 : f32
    %364 = vector.broadcast %cst_88 : f32 to vector<2x64xf32>
    %365 = arith.addf %364, %363 : vector<2x64xf32>
    %366 = arith.divf %364, %365 : vector<2x64xf32>
    %367 = arith.mulf %358, %337 : vector<2x64xf32>
    %368 = arith.mulf %352, %360 : vector<2x64xf32>
    %369 = arith.addf %367, %368 : vector<2x64xf32>
    %370 = math.tanh %369 : vector<2x64xf32>
    %371 = arith.mulf %366, %370 : vector<2x64xf32>
    %c2_89 = arith.constant 2 : index
    %c0_90 = arith.constant 0 : index
    %c0_91 = arith.constant 0 : index
    %372 = vector.load %arg7[%c2_89, %c0_90, %c0_91] : memref<8x64x128xf32, #tpu.memory_space<vmem>>, vector<1x64x128xf32>
    %373 = vector.shape_cast %372 : vector<1x64x128xf32> to vector<64x128xf32>
    %cst_92 = arith.constant dense<0.000000e+00> : vector<2x128xf32>
    %374 = tpu.matmul %371, %373, %cst_92 {dimension_numbers = #tpu.dot_dimension_numbers<[1], [0], [0], [1], [0, 0, 1, 1], [], []>} : vector<2x64xf32>, vector<64x128xf32>, vector<2x128xf32> -> vector<2x128xf32>
    %375 = arith.addf %343, %374 : vector<2x128xf32>
    %376 = vector.extract_strided_slice %276 {offsets = [6, 0], sizes = [2, 256], strides = [1, 1]} : vector<16x256xf32> to vector<2x256xf32>
    %cst_93 = arith.constant dense<0.000000e+00> : vector<2x256xf32>
    %377 = tpu.matmul %371, %4, %cst_93 {dimension_numbers = #tpu.dot_dimension_numbers<[1], [0], [0], [1], [0, 0, 1, 1], [], []>} : vector<2x64xf32>, vector<64x256xf32>, vector<2x256xf32> -> vector<2x256xf32>
    %378 = arith.addf %376, %377 : vector<2x256xf32>
    %379 = vector.extract_strided_slice %378 {offsets = [0, 0], sizes = [2, 64], strides = [1, 1]} : vector<2x256xf32> to vector<2x64xf32>
    %380 = arith.negf %379 : vector<2x64xf32>
    %381 = math.exp %380 : vector<2x64xf32>
    %cst_94 = arith.constant 1.000000e+00 : f32
    %382 = vector.broadcast %cst_94 : f32 to vector<2x64xf32>
    %383 = arith.addf %382, %381 : vector<2x64xf32>
    %384 = arith.divf %382, %383 : vector<2x64xf32>
    %385 = vector.extract_strided_slice %378 {offsets = [0, 64], sizes = [2, 64], strides = [1, 1]} : vector<2x256xf32> to vector<2x64xf32>
    %386 = arith.negf %385 : vector<2x64xf32>
    %387 = math.exp %386 : vector<2x64xf32>
    %cst_95 = arith.constant 1.000000e+00 : f32
    %388 = vector.broadcast %cst_95 : f32 to vector<2x64xf32>
    %389 = arith.addf %388, %387 : vector<2x64xf32>
    %390 = arith.divf %388, %389 : vector<2x64xf32>
    %391 = vector.extract_strided_slice %378 {offsets = [0, 128], sizes = [2, 64], strides = [1, 1]} : vector<2x256xf32> to vector<2x64xf32>
    %392 = math.tanh %391 : vector<2x64xf32>
    %393 = vector.extract_strided_slice %378 {offsets = [0, 192], sizes = [2, 64], strides = [1, 1]} : vector<2x256xf32> to vector<2x64xf32>
    %394 = arith.negf %393 : vector<2x64xf32>
    %395 = math.exp %394 : vector<2x64xf32>
    %cst_96 = arith.constant 1.000000e+00 : f32
    %396 = vector.broadcast %cst_96 : f32 to vector<2x64xf32>
    %397 = arith.addf %396, %395 : vector<2x64xf32>
    %398 = arith.divf %396, %397 : vector<2x64xf32>
    %399 = arith.mulf %390, %369 : vector<2x64xf32>
    %400 = arith.mulf %384, %392 : vector<2x64xf32>
    %401 = arith.addf %399, %400 : vector<2x64xf32>
    %402 = math.tanh %401 : vector<2x64xf32>
    %403 = arith.mulf %398, %402 : vector<2x64xf32>
    %c3 = arith.constant 3 : index
    %c0_97 = arith.constant 0 : index
    %c0_98 = arith.constant 0 : index
    %404 = vector.load %arg7[%c3, %c0_97, %c0_98] : memref<8x64x128xf32, #tpu.memory_space<vmem>>, vector<1x64x128xf32>
    %405 = vector.shape_cast %404 : vector<1x64x128xf32> to vector<64x128xf32>
    %cst_99 = arith.constant dense<0.000000e+00> : vector<2x128xf32>
    %406 = tpu.matmul %403, %405, %cst_99 {dimension_numbers = #tpu.dot_dimension_numbers<[1], [0], [0], [1], [0, 0, 1, 1], [], []>} : vector<2x64xf32>, vector<64x128xf32>, vector<2x128xf32> -> vector<2x128xf32>
    %407 = arith.addf %375, %406 : vector<2x128xf32>
    %408 = vector.extract_strided_slice %276 {offsets = [8, 0], sizes = [2, 256], strides = [1, 1]} : vector<16x256xf32> to vector<2x256xf32>
    %cst_100 = arith.constant dense<0.000000e+00> : vector<2x256xf32>
    %409 = tpu.matmul %403, %4, %cst_100 {dimension_numbers = #tpu.dot_dimension_numbers<[1], [0], [0], [1], [0, 0, 1, 1], [], []>} : vector<2x64xf32>, vector<64x256xf32>, vector<2x256xf32> -> vector<2x256xf32>
    %410 = arith.addf %408, %409 : vector<2x256xf32>
    %411 = vector.extract_strided_slice %410 {offsets = [0, 0], sizes = [2, 64], strides = [1, 1]} : vector<2x256xf32> to vector<2x64xf32>
    %412 = arith.negf %411 : vector<2x64xf32>
    %413 = math.exp %412 : vector<2x64xf32>
    %cst_101 = arith.constant 1.000000e+00 : f32
    %414 = vector.broadcast %cst_101 : f32 to vector<2x64xf32>
    %415 = arith.addf %414, %413 : vector<2x64xf32>
    %416 = arith.divf %414, %415 : vector<2x64xf32>
    %417 = vector.extract_strided_slice %410 {offsets = [0, 64], sizes = [2, 64], strides = [1, 1]} : vector<2x256xf32> to vector<2x64xf32>
    %418 = arith.negf %417 : vector<2x64xf32>
    %419 = math.exp %418 : vector<2x64xf32>
    %cst_102 = arith.constant 1.000000e+00 : f32
    %420 = vector.broadcast %cst_102 : f32 to vector<2x64xf32>
    %421 = arith.addf %420, %419 : vector<2x64xf32>
    %422 = arith.divf %420, %421 : vector<2x64xf32>
    %423 = vector.extract_strided_slice %410 {offsets = [0, 128], sizes = [2, 64], strides = [1, 1]} : vector<2x256xf32> to vector<2x64xf32>
    %424 = math.tanh %423 : vector<2x64xf32>
    %425 = vector.extract_strided_slice %410 {offsets = [0, 192], sizes = [2, 64], strides = [1, 1]} : vector<2x256xf32> to vector<2x64xf32>
    %426 = arith.negf %425 : vector<2x64xf32>
    %427 = math.exp %426 : vector<2x64xf32>
    %cst_103 = arith.constant 1.000000e+00 : f32
    %428 = vector.broadcast %cst_103 : f32 to vector<2x64xf32>
    %429 = arith.addf %428, %427 : vector<2x64xf32>
    %430 = arith.divf %428, %429 : vector<2x64xf32>
    %431 = arith.mulf %422, %401 : vector<2x64xf32>
    %432 = arith.mulf %416, %424 : vector<2x64xf32>
    %433 = arith.addf %431, %432 : vector<2x64xf32>
    %434 = math.tanh %433 : vector<2x64xf32>
    %435 = arith.mulf %430, %434 : vector<2x64xf32>
    %c4_104 = arith.constant 4 : index
    %c0_105 = arith.constant 0 : index
    %c0_106 = arith.constant 0 : index
    %436 = vector.load %arg7[%c4_104, %c0_105, %c0_106] : memref<8x64x128xf32, #tpu.memory_space<vmem>>, vector<1x64x128xf32>
    %437 = vector.shape_cast %436 : vector<1x64x128xf32> to vector<64x128xf32>
    %cst_107 = arith.constant dense<0.000000e+00> : vector<2x128xf32>
    %438 = tpu.matmul %435, %437, %cst_107 {dimension_numbers = #tpu.dot_dimension_numbers<[1], [0], [0], [1], [0, 0, 1, 1], [], []>} : vector<2x64xf32>, vector<64x128xf32>, vector<2x128xf32> -> vector<2x128xf32>
    %439 = arith.addf %407, %438 : vector<2x128xf32>
    %440 = vector.extract_strided_slice %276 {offsets = [10, 0], sizes = [2, 256], strides = [1, 1]} : vector<16x256xf32> to vector<2x256xf32>
    %cst_108 = arith.constant dense<0.000000e+00> : vector<2x256xf32>
    %441 = tpu.matmul %435, %4, %cst_108 {dimension_numbers = #tpu.dot_dimension_numbers<[1], [0], [0], [1], [0, 0, 1, 1], [], []>} : vector<2x64xf32>, vector<64x256xf32>, vector<2x256xf32> -> vector<2x256xf32>
    %442 = arith.addf %440, %441 : vector<2x256xf32>
    %443 = vector.extract_strided_slice %442 {offsets = [0, 0], sizes = [2, 64], strides = [1, 1]} : vector<2x256xf32> to vector<2x64xf32>
    %444 = arith.negf %443 : vector<2x64xf32>
    %445 = math.exp %444 : vector<2x64xf32>
    %cst_109 = arith.constant 1.000000e+00 : f32
    %446 = vector.broadcast %cst_109 : f32 to vector<2x64xf32>
    %447 = arith.addf %446, %445 : vector<2x64xf32>
    %448 = arith.divf %446, %447 : vector<2x64xf32>
    %449 = vector.extract_strided_slice %442 {offsets = [0, 64], sizes = [2, 64], strides = [1, 1]} : vector<2x256xf32> to vector<2x64xf32>
    %450 = arith.negf %449 : vector<2x64xf32>
    %451 = math.exp %450 : vector<2x64xf32>
    %cst_110 = arith.constant 1.000000e+00 : f32
    %452 = vector.broadcast %cst_110 : f32 to vector<2x64xf32>
    %453 = arith.addf %452, %451 : vector<2x64xf32>
    %454 = arith.divf %452, %453 : vector<2x64xf32>
    %455 = vector.extract_strided_slice %442 {offsets = [0, 128], sizes = [2, 64], strides = [1, 1]} : vector<2x256xf32> to vector<2x64xf32>
    %456 = math.tanh %455 : vector<2x64xf32>
    %457 = vector.extract_strided_slice %442 {offsets = [0, 192], sizes = [2, 64], strides = [1, 1]} : vector<2x256xf32> to vector<2x64xf32>
    %458 = arith.negf %457 : vector<2x64xf32>
    %459 = math.exp %458 : vector<2x64xf32>
    %cst_111 = arith.constant 1.000000e+00 : f32
    %460 = vector.broadcast %cst_111 : f32 to vector<2x64xf32>
    %461 = arith.addf %460, %459 : vector<2x64xf32>
    %462 = arith.divf %460, %461 : vector<2x64xf32>
    %463 = arith.mulf %454, %433 : vector<2x64xf32>
    %464 = arith.mulf %448, %456 : vector<2x64xf32>
    %465 = arith.addf %463, %464 : vector<2x64xf32>
    %466 = math.tanh %465 : vector<2x64xf32>
    %467 = arith.mulf %462, %466 : vector<2x64xf32>
    %c5 = arith.constant 5 : index
    %c0_112 = arith.constant 0 : index
    %c0_113 = arith.constant 0 : index
    %468 = vector.load %arg7[%c5, %c0_112, %c0_113] : memref<8x64x128xf32, #tpu.memory_space<vmem>>, vector<1x64x128xf32>
    %469 = vector.shape_cast %468 : vector<1x64x128xf32> to vector<64x128xf32>
    %cst_114 = arith.constant dense<0.000000e+00> : vector<2x128xf32>
    %470 = tpu.matmul %467, %469, %cst_114 {dimension_numbers = #tpu.dot_dimension_numbers<[1], [0], [0], [1], [0, 0, 1, 1], [], []>} : vector<2x64xf32>, vector<64x128xf32>, vector<2x128xf32> -> vector<2x128xf32>
    %471 = arith.addf %439, %470 : vector<2x128xf32>
    %472 = vector.extract_strided_slice %276 {offsets = [12, 0], sizes = [2, 256], strides = [1, 1]} : vector<16x256xf32> to vector<2x256xf32>
    %cst_115 = arith.constant dense<0.000000e+00> : vector<2x256xf32>
    %473 = tpu.matmul %467, %4, %cst_115 {dimension_numbers = #tpu.dot_dimension_numbers<[1], [0], [0], [1], [0, 0, 1, 1], [], []>} : vector<2x64xf32>, vector<64x256xf32>, vector<2x256xf32> -> vector<2x256xf32>
    %474 = arith.addf %472, %473 : vector<2x256xf32>
    %475 = vector.extract_strided_slice %474 {offsets = [0, 0], sizes = [2, 64], strides = [1, 1]} : vector<2x256xf32> to vector<2x64xf32>
    %476 = arith.negf %475 : vector<2x64xf32>
    %477 = math.exp %476 : vector<2x64xf32>
    %cst_116 = arith.constant 1.000000e+00 : f32
    %478 = vector.broadcast %cst_116 : f32 to vector<2x64xf32>
    %479 = arith.addf %478, %477 : vector<2x64xf32>
    %480 = arith.divf %478, %479 : vector<2x64xf32>
    %481 = vector.extract_strided_slice %474 {offsets = [0, 64], sizes = [2, 64], strides = [1, 1]} : vector<2x256xf32> to vector<2x64xf32>
    %482 = arith.negf %481 : vector<2x64xf32>
    %483 = math.exp %482 : vector<2x64xf32>
    %cst_117 = arith.constant 1.000000e+00 : f32
    %484 = vector.broadcast %cst_117 : f32 to vector<2x64xf32>
    %485 = arith.addf %484, %483 : vector<2x64xf32>
    %486 = arith.divf %484, %485 : vector<2x64xf32>
    %487 = vector.extract_strided_slice %474 {offsets = [0, 128], sizes = [2, 64], strides = [1, 1]} : vector<2x256xf32> to vector<2x64xf32>
    %488 = math.tanh %487 : vector<2x64xf32>
    %489 = vector.extract_strided_slice %474 {offsets = [0, 192], sizes = [2, 64], strides = [1, 1]} : vector<2x256xf32> to vector<2x64xf32>
    %490 = arith.negf %489 : vector<2x64xf32>
    %491 = math.exp %490 : vector<2x64xf32>
    %cst_118 = arith.constant 1.000000e+00 : f32
    %492 = vector.broadcast %cst_118 : f32 to vector<2x64xf32>
    %493 = arith.addf %492, %491 : vector<2x64xf32>
    %494 = arith.divf %492, %493 : vector<2x64xf32>
    %495 = arith.mulf %486, %465 : vector<2x64xf32>
    %496 = arith.mulf %480, %488 : vector<2x64xf32>
    %497 = arith.addf %495, %496 : vector<2x64xf32>
    %498 = math.tanh %497 : vector<2x64xf32>
    %499 = arith.mulf %494, %498 : vector<2x64xf32>
    %c6_119 = arith.constant 6 : index
    %c0_120 = arith.constant 0 : index
    %c0_121 = arith.constant 0 : index
    %500 = vector.load %arg7[%c6_119, %c0_120, %c0_121] : memref<8x64x128xf32, #tpu.memory_space<vmem>>, vector<1x64x128xf32>
    %501 = vector.shape_cast %500 : vector<1x64x128xf32> to vector<64x128xf32>
    %cst_122 = arith.constant dense<0.000000e+00> : vector<2x128xf32>
    %502 = tpu.matmul %499, %501, %cst_122 {dimension_numbers = #tpu.dot_dimension_numbers<[1], [0], [0], [1], [0, 0, 1, 1], [], []>} : vector<2x64xf32>, vector<64x128xf32>, vector<2x128xf32> -> vector<2x128xf32>
    %503 = arith.addf %471, %502 : vector<2x128xf32>
    %504 = vector.extract_strided_slice %276 {offsets = [14, 0], sizes = [2, 256], strides = [1, 1]} : vector<16x256xf32> to vector<2x256xf32>
    %cst_123 = arith.constant dense<0.000000e+00> : vector<2x256xf32>
    %505 = tpu.matmul %499, %4, %cst_123 {dimension_numbers = #tpu.dot_dimension_numbers<[1], [0], [0], [1], [0, 0, 1, 1], [], []>} : vector<2x64xf32>, vector<64x256xf32>, vector<2x256xf32> -> vector<2x256xf32>
    %506 = arith.addf %504, %505 : vector<2x256xf32>
    %507 = vector.extract_strided_slice %506 {offsets = [0, 0], sizes = [2, 64], strides = [1, 1]} : vector<2x256xf32> to vector<2x64xf32>
    %508 = arith.negf %507 : vector<2x64xf32>
    %509 = math.exp %508 : vector<2x64xf32>
    %cst_124 = arith.constant 1.000000e+00 : f32
    %510 = vector.broadcast %cst_124 : f32 to vector<2x64xf32>
    %511 = arith.addf %510, %509 : vector<2x64xf32>
    %512 = arith.divf %510, %511 : vector<2x64xf32>
    %513 = vector.extract_strided_slice %506 {offsets = [0, 64], sizes = [2, 64], strides = [1, 1]} : vector<2x256xf32> to vector<2x64xf32>
    %514 = arith.negf %513 : vector<2x64xf32>
    %515 = math.exp %514 : vector<2x64xf32>
    %cst_125 = arith.constant 1.000000e+00 : f32
    %516 = vector.broadcast %cst_125 : f32 to vector<2x64xf32>
    %517 = arith.addf %516, %515 : vector<2x64xf32>
    %518 = arith.divf %516, %517 : vector<2x64xf32>
    %519 = vector.extract_strided_slice %506 {offsets = [0, 128], sizes = [2, 64], strides = [1, 1]} : vector<2x256xf32> to vector<2x64xf32>
    %520 = math.tanh %519 : vector<2x64xf32>
    %521 = vector.extract_strided_slice %506 {offsets = [0, 192], sizes = [2, 64], strides = [1, 1]} : vector<2x256xf32> to vector<2x64xf32>
    %522 = arith.negf %521 : vector<2x64xf32>
    %523 = math.exp %522 : vector<2x64xf32>
    %cst_126 = arith.constant 1.000000e+00 : f32
    %524 = vector.broadcast %cst_126 : f32 to vector<2x64xf32>
    %525 = arith.addf %524, %523 : vector<2x64xf32>
    %526 = arith.divf %524, %525 : vector<2x64xf32>
    %527 = arith.mulf %518, %497 : vector<2x64xf32>
    %528 = arith.mulf %512, %520 : vector<2x64xf32>
    %529 = arith.addf %527, %528 : vector<2x64xf32>
    %530 = math.tanh %529 : vector<2x64xf32>
    %531 = arith.mulf %526, %530 : vector<2x64xf32>
    %c7 = arith.constant 7 : index
    %c0_127 = arith.constant 0 : index
    %c0_128 = arith.constant 0 : index
    %532 = vector.load %arg7[%c7, %c0_127, %c0_128] : memref<8x64x128xf32, #tpu.memory_space<vmem>>, vector<1x64x128xf32>
    %533 = vector.shape_cast %532 : vector<1x64x128xf32> to vector<64x128xf32>
    %cst_129 = arith.constant dense<0.000000e+00> : vector<2x128xf32>
    %534 = tpu.matmul %531, %533, %cst_129 {dimension_numbers = #tpu.dot_dimension_numbers<[1], [0], [0], [1], [0, 0, 1, 1], [], []>} : vector<2x64xf32>, vector<64x128xf32>, vector<2x128xf32> -> vector<2x128xf32>
    %535 = arith.addf %503, %534 : vector<2x128xf32>
    %c0_130 = arith.constant 0 : index
    %c0_131 = arith.constant 0 : index
    %536 = vector.load %arg8[%c0_130, %c0_131] : memref<1x128xf32, #tpu.memory_space<vmem>>, vector<1x128xf32>
    %537 = vector.broadcast %536 : vector<1x128xf32> to vector<2x128xf32>
    %538 = arith.addf %535, %537 : vector<2x128xf32>
    %539 = vector.extract_strided_slice %538 {offsets = [0, 0], sizes = [2, 10], strides = [1, 1]} : vector<2x128xf32> to vector<2x10xf32>
    %c0_132 = arith.constant 0 : index
    %c0_133 = arith.constant 0 : index
    %540 = vector.load %arg9[%c0_132, %c0_133] : memref<2x10xf32, #tpu.memory_space<vmem>>, vector<2x10xf32>
    tpu.vector_store %arg9[%c0_132, %c0_133], %539 {strides = array<i32>} : memref<2x10xf32, #tpu.memory_space<vmem>>, vector<2x10xf32>,
    return
  }
}

</mosaic_0001>

<bundles_post_ra>
// kernel: sequential_model_forward.1
= control target key start
LH: loop header
LB: loop body
LE: loop exit
PB: predicated region body
PF: predicated region fallthrough
CT: control target
= control target key end

     0   :  { %14 = vsyncpa [#allocation4], 0  ;;  %s3119_s0 = inlined_call_operand.hbm [shape: f32[2,8,16], index: 0, kind: input, shape index: {}]   ;;  %s3120_s1 = inlined_call_operand.hbm [shape: f32[16,128], index: 1, kind: input, shape index: {}]   ;;  %s3121_s2 = inlined_call_operand.hbm [shape: f32[32,128], index: 2, kind: input, shape index: {}]   ;;  %s3122_s3 = inlined_call_operand.hbm [shape: f32[1,128], index: 3, kind: input, shape index: {}]   ;;  %s3123_s4 = inlined_call_operand.hbm [shape: f32[32,256], index: 4, kind: input, shape index: {}]   ;;  %s3124_s5 = inlined_call_operand.hbm [shape: f32[64,256], index: 5, kind: input, shape index: {}]   ;;  %s3125_s6 = inlined_call_operand.hbm [shape: f32[1,256], index: 6, kind: input, shape index: {}]   ;;  %s3126_s7 = inlined_call_operand.hbm [shape: f32[8,64,128], index: 7, kind: input, shape index: {}]   ;;  %s3127_s8 = inlined_call_operand.vmem [shape: f32[1,128], index: 8, kind: input, shape index: {}]   ;;  %s3128_s9 = inlined_call_operand.hbm [shape: f32[2,10], index: 9, kind: output, shape index: {}]  }
   0x1   :  { %15 = vsyncpa [#allocation7], 0 }
   0x2   :  { %16 = vsyncpa [#allocation10], 0 }
   0x3   :  { %17 = vsyncpa [#allocation13], 0 }
   0x4   :  { %18 = vsyncpa [#allocation16], 0 }
   0x5   :  { %19 = vsyncpa [#allocation5], 0  ;;  %s37_s11 = sshll.u32 %s3120_s1, 4  ;;  %s2553_s12 = smov [#allocation6]   ;;  %s38_s11 = int_to_ptr.hbm [resolvable:$true] %s37_s11 }
   0x6   :  { %s39_s13 = sshll.u32 %s2553_s12, 4  ;;  %s64_s16 = sshll.u32 %s3122_s3, 4  ;;  %s40_s13 = int_to_ptr.vmem [resolvable:$true] %s39_s13  ;;  %s65_s16 = int_to_ptr.hbm [resolvable:$true] %s64_s16 }
   0x7   :  { %s2554_s17 = smov 128   ;;  %s2555_s18 = smov 8  }
   0x8   :  { %45 = dma.hbm_to_vmem [thread:$0]  %s38_s11, 256, %s40_s13, [#allocation7], %s2554_s17, %s2554_s17, %s2555_s18  }
   0x9   :  { %s2556_s19 = smov [#allocation9]   ;;  %s87_s22 = sshll.u32 %s3124_s5, 4  ;;  %s88_s22 = int_to_ptr.hbm [resolvable:$true] %s87_s22 }
   0xa   :  { %s66_s20 = sshll.u32 %s2556_s19, 4  ;;  %s2557_s23 = smov [#allocation12]   ;;  %s67_s20 = int_to_ptr.vmem [resolvable:$true] %s66_s20 }
   0xb   :  { %69 = dma.hbm_to_vmem [thread:$0]  %s65_s16, 16, %s67_s20, [#allocation10]  }
   0xc   :  { %s89_s24 = sshll.u32 %s2557_s23, 4  ;;  %s24_s26 = sshll.u32 %s3119_s0, 4  ;;  %s90_s24 = int_to_ptr.vmem [resolvable:$true] %s89_s24  ;;  %s25_s26 = int_to_ptr.hbm [resolvable:$true] %s24_s26 }
   0xd   :  { %s2558_s27 = smov 256   ;;  %s2559_s28 = smov 16  }
   0xe   :  { %95 = dma.hbm_to_vmem [thread:$0]  %s88_s22, 2048, %s90_s24, [#allocation13], %s2558_s27, %s2558_s27, %s2559_s28  }
   0xf   :  { %s2560_s29 = smov [#allocation3]   ;;  %s50_s12 = sshll.u32 %s3121_s2, 4  ;;  %s51_s12 = int_to_ptr.hbm [resolvable:$true] %s50_s12 }
  0x10   :  { %s26_s30 = sshll.u32 %s2560_s29, 4  ;;  %s74_s0 = sshll.u32 %s3123_s4, 4  ;;  %s27_s30 = int_to_ptr.vmem [resolvable:$true] %s26_s30  ;;  %s75_s0 = int_to_ptr.hbm [resolvable:$true] %s74_s0 }
  0x11   :  { %32 = dma.hbm_to_vmem [thread:$0]  %s25_s26, 256, %s27_s30, [#allocation4], %s2554_s17, %s2554_s17, %s2555_s18  }
  0x12   :  { %s2561_s14 = smov [#allocation8]   ;;  %s2562_s16 = smov [#allocation11]  }
  0x13   :  { %s52_s15 = sshll.u32 %s2561_s14, 4  ;;  %s76_s2 = sshll.u32 %s2562_s16, 4  ;;  %s53_s15 = int_to_ptr.vmem [resolvable:$true] %s52_s15  ;;  %s77_s2 = int_to_ptr.vmem [resolvable:$true] %s76_s2 }
  0x14   :  { %58 = dma.hbm_to_vmem [thread:$0]  %s51_s12, 512, %s53_s15, [#allocation7], %s2554_s17, %s2554_s17, %s2555_s18  }
  0x15   :  { %s101_s1 = sshll.u32 %s3125_s6, 4  ;;  %s111_s4 = sshll.u32 %s3126_s7, 4  ;;  %s102_s1 = int_to_ptr.hbm [resolvable:$true] %s101_s1  ;;  %s112_s4 = int_to_ptr.hbm [resolvable:$true] %s111_s4 }
  0x16   :  { %82 = dma.hbm_to_vmem [thread:$0]  %s75_s0, 1024, %s77_s2, [#allocation10], %s2558_s27, %s2558_s27, %s2559_s28  }
  0x17   :  { %s2563_s23 = smov [#allocation14]   ;;  %s2564_s3 = smov [#allocation15]  }
  0x18   :  { %s103_s24 = sshll.u32 %s2563_s23, 4  ;;  %s113_s25 = sshll.u32 %s2564_s3, 4  ;;  %s104_s24 = int_to_ptr.vmem [resolvable:$true] %s103_s24  ;;  %s114_s25 = int_to_ptr.vmem [resolvable:$true] %s113_s25 }
  0x19   :  { %106 = dma.hbm_to_vmem [thread:$0]  %s102_s1, 32, %s104_s24, [#allocation13]  }
  0x1a   :  { %119 = dma.hbm_to_vmem [thread:$0]  %s112_s4, 8192, %s114_s25, [#allocation16], %s2554_s17, %s2554_s17, %s2555_s18  }
  0x1b   :  { %2541 = dma.done.wait [#allocation4], 256  }
  0x1c   :  { %2542 = vsyncadd [#allocation4], 4294967040 }
  0x1d   :  { %2543 = dma.done.wait [#allocation7], 768  }
  0x1e   :  { %2544 = vsyncadd [#allocation7], 4294966528 }
  0x1f   :  { %2545 = dma.done.wait [#allocation10], 1040  }
  0x20   :  { %2546 = vsyncadd [#allocation10], 4294966256 }
  0x21   :  { %2547 = dma.done.wait [#allocation13], 2080  }
  0x22   :  { %2548 = vsyncadd [#allocation13], 4294965216 }
  0x23   :  { %2549 = dma.done.wait [#allocation16], 8192  }
  0x24   :  { %2550 = vsyncadd [#allocation16], 4294959104  ;;  %v2655_v0 = vld [vmem:[#allocation8 + $0x18] sm:$0xff]  ;;  %v2657_v1 = vld [vmem:[#allocation8 + $0x10] sm:$0xff]  ;;  %vm206_vm0 = vcmask 1041409   ;;  %vm208_vm1 = vcmask 130048  }
  0x25   :  { %195 = vmatpush.msra.mxu0 %v2655_v0  ;;  %v2660_v2 = vld [vmem:[#allocation8 + $0x8] sm:$0xff]  ;;  %v2662_v3 = vld [vmem:[#allocation6 + $0x8] sm:$0xff]  ;;  %v2664_v4 = vld [vmem:[#allocation6] sm:$0xff]  ;;  %292 = vmatpush.msra.mxu2 %v2655_v0  ;;  %v2565_v10 = vmov 0.0   ;;  %s2566_s6 = smov 64   ;;  %s2567_s7 = smov 32  }
  0x26   :  { %225 = vmatpush.msra.mxu1 %v2662_v3  ;;  %v2668_v5 = vld [vmem:[#allocation3] sm:$0xff]  ;;  %v2670_v6 = vld [vmem:[#allocation3 + $0x8] sm:$0xff]  ;;  %318 = vmatpush.msra.mxu3 %v2662_v3  ;;  %vm276_vm6 = vcmask 254976   ;;  %vm179_vm7 = vcmask 261120   ;;  %s2568_s26 = smov [#allocation17]   ;;  %s2052_s30 = sshll.u32 %s3128_s9, 4  ;;  %s2053_s30 = int_to_ptr.hbm [resolvable:$true] %s2052_s30 }
  0x27   :  { %196 = vmatpush.msra.mxu0 %v2657_v1  ;;  %v205_v7 = vrot.slane %v2670_v6, 7  ;;  %293 = vmatpush.msra.mxu2 %v2657_v1  ;;  %v2676_v8 = vld [vmem:[#allocation8] sm:$0xff]  ;;  %v300_v38 = vrot.slane %v2668_v5, 1  ;;  %s2050_s27 = sshll.u32 %s2568_s26, 4  ;;  %s2051_s27 = int_to_ptr.vmem [resolvable:$true] %s2050_s27 }
  0x28   :  { %226 = vmatpush.msra.mxu1 %v2664_v4  ;;  %319 = vmatpush.msra.mxu3 %v2664_v4  ;;  %v2708_v12 = vld [vmem:[#allocation9] ss:$0 sm:$0xff] }
  0x29   :  { %197 = vmatpush.msra.mxu0 %v2660_v2  ;;  %v207_v9 = vsel %vm206_vm0, %v205_v7, %v2668_v5  ;;  %294 = vmatpush.msra.mxu2 %v2660_v2  ;;  %v301_v39 = vsel %vm206_vm0, %v2670_v6, %v300_v38 }
  0x2a   :  { %2066 = vmatmul.msk.f32.vlgmr.msra.gmra.mxu1 %vm208_vm1, %v207_v9  ;;  %408 = vmatpush.msrb.mxu3 %v2662_v3  ;;  %v389_v9 = vrot.slane %v2668_v5, 2 }
  0x2b   :  { %198 = vmatpush.msra.mxu0 %v2676_v8  ;;  %295 = vmatpush.msra.mxu2 %v2676_v8 }
  0x2c   :  { %199 = vmatmul.f32.vlgmr.msra.gmra.mxu0 %v2565_v10  ;;  %409 = vmatpush.msrb.mxu3 %v2664_v4 }
  0x2d   :  { %381 = vmatpush.msrb.mxu1 %v2655_v0  ;;  %498 = vmatpush.msrb.mxu2 %v2662_v3 }
  0x2e   :  { %471 = vmatpush.msrb.mxu0 %v2655_v0  ;;  %2069 = vmatmul.msk.f32.vlgmr.msra.gmra.mxu3 %vm208_vm1, %v301_v39 }
  0x2f   :  { %382 = vmatpush.msrb.mxu1 %v2657_v1  ;;  %499 = vmatpush.msrb.mxu2 %v2664_v4 }
  0x30   :  { %472 = vmatpush.msrb.mxu0 %v2657_v1  ;;  %588 = vmatpush.msra.mxu3 %v2662_v3 }
  0x31   :  { %383 = vmatpush.msrb.mxu1 %v2660_v2 }
  0x32   :  { %473 = vmatpush.msrb.mxu0 %v2660_v2  ;;  %589 = vmatpush.msra.mxu3 %v2664_v4 }
  0x33   :  { %384 = vmatpush.msrb.mxu1 %v2676_v8 }
  0x34   :  { %474 = vmatpush.msrb.mxu0 %v2676_v8 }
  0x35   :  { %561 = vmatpush.msra.mxu1 %v2655_v0 }
  0x36   :  { %651 = vmatpush.msra.mxu0 %v2655_v0 }
  0x37   :  { %562 = vmatpush.msra.mxu1 %v2657_v1 }
  0x38   :  { %652 = vmatpush.msra.mxu0 %v2657_v1 }
  0x39   :  { %563 = vmatpush.msra.mxu1 %v2660_v2 }
  0x3a   :  { %653 = vmatpush.msra.mxu0 %v2660_v2 }
  0x3b   :  { %564 = vmatpush.msra.mxu1 %v2676_v8 }
  0x3c   :  { %654 = vmatpush.msra.mxu0 %v2676_v8 }
  0xa7   :  { %v228_v11 = vpop.f32.mrf.mxu1 }
  0xa9   :  { %v200_v13 = vpop.f32.mrf.mxu0 }
  0xaa   :  { %v229_v14 = vadd.f32 %v228_v11, %v200_v13  ;;  %v390_v11 = vrot.slane %v2670_v6, 1 }
  0xac   :  { %v234_v15 = vadd.f32 %v2708_v12, %v229_v14  ;;  %v391_v13 = vsel %vm206_vm0, %v390_v11, %v389_v9  ;;  %v569_v9 = vrot.slane %v2668_v5, 4  ;;  %v570_v11 = vrot.slane %v2670_v6, 3 }
  0xad   :  { %2072 = vmatmul.msk.f32.vlgmr.msrb.gmra.mxu3 %vm208_vm1, %v391_v13  ;;  %v659_v13 = vrot.slane %v2668_v5, 5 }
  0xae   :  { %2149 = vtanh.f32 %v234_v15  ;;  %v2067_v17 = vmul.f32 -1.442695, %v234_v15  ;;  %768 = vmatpush.msrb.mxu3 %v2662_v3 }
  0xb0   :  { %2151 = vpow2.f32 %v2067_v17  ;;  %769 = vmatpush.msrb.mxu3 %v2664_v4 }
  0xb1   :  { %v321_v41 = vpop.f32.mrf.mxu3 }
  0xb4   :  { %v2150_v16 = vpop.eup %2149 }
  0xb5   :  { %257 = vrot.lane.b32.xlu0 %v2150_v16, %s2566_s6 }
  0xb6   :  { %v2152_v18 = vpop.eup %2151 }
  0xb7   :  { %v238_v19 = vadd.f32 1.0, %v2152_v18 }
  0xb9   :  { %2153 = vrcp.f32 %v238_v19  ;;  %v250_v25 = vand.u32 2147483648, %v238_v19  ;;  %vm244_vm3 = vweird.f32 %v238_v19  ;;  %v248_v26 = vand.u32 2147483647, %v238_v19 }
  0xbb   :  { %v251_v28 = vor.u32 1.1754944e-38, %v250_v25  ;;  %vm249_vm5 = vcmp.eq.f32.partialorder %v248_v26, 8.507059e+37 }
  0xbf   :  { %v2154_v20 = vpop.eup %2153 }
  0xc0   :  { %v240_v21 = vmul.f32 %v2154_v20, %v238_v19  ;;  %vm245_vm2 = vweird.f32 %v2154_v20 }
  0xc1   :  { %vm246_vm4 = vmor %vm244_vm3, %vm245_vm2 }
  0xc2   :  { %v241_v22 = vsub.f32 1.0, %v240_v21 }
  0xc4   :  { %v242_v23 = vmul.f32 %v2154_v20, %v241_v22 }
  0xc6   :  { %v243_v24 = vadd.f32 %v2154_v20, %v242_v23 }
  0xc8   :  { %v247_v27 = vsel %vm246_vm4, %v2154_v20, %v243_v24 }
  0xc9   :  { %v252_v30 = vsel %vm249_vm5, %v251_v28, %v247_v27 }
  0xca   :  { %v255_v32 = vmul.f32 0.0, %v252_v30 }
 0x127   :  { %v258_v29 = vpop.permute.xlu0 %257 }
 0x128   :  { %v260_v31 = vmul.f32 %v258_v29, %v252_v30 }
 0x12a   :  { %262 = vrot.lane.b32.xlu0 %v260_v31, %s2567_s7 }
 0x130   :  { %v411_v17 = vpop.f32.mrf.mxu3 }
 0x19c   :  { %v263_v33 = vpop.permute.xlu0 %262 }
 0x19d   :  { %v265_v34 = vadd.f32 %v263_v33, %v255_v32 }
 0x19f   :  { %2155 = vtanh.f32 %v265_v34 }
 0x1a5   :  { %v2156_v35 = vpop.eup %2155 }
 0x1a6   :  { %268 = vrot.lane.b32.xlu1 %v2156_v35, %s2566_s6 }
 0x218   :  { %v269_v36 = vpop.permute.xlu1 %268 }
 0x219   :  { %v271_v37 = vmul.f32 %v269_v36, %v252_v30 }
 0x21b   :  { %273 = vrot.lane.b32.xlu1 %v271_v37, %s2567_s7 }
 0x28d   :  { %v274_v40 = vpop.permute.xlu1 %273 }
 0x28e   :  { %277 = vst.msk [vmem:[#allocation2] sm:$0x3] %vm276_vm6, %v274_v40  ;;  %2068 = vmatmul.msk.f32.vlgmr.msra.gmra.mxu2 %vm179_vm7, %v274_v40 }
 0x28f   :  { %678 = vmatpush.msra.mxu2 %v2662_v3 }
 0x291   :  { %679 = vmatpush.msra.mxu2 %v2664_v4 }
 0x311   :  { %v297_v42 = vpop.f32.mrf.mxu2 }
 0x312   :  { %v322_v43 = vadd.f32 %v321_v41, %v297_v42  ;;  %v479_v41 = vrot.slane %v2668_v5, 3  ;;  %v480_v42 = vrot.slane %v2670_v6, 2 }
 0x314   :  { %v324_v44 = vadd.f32 %v2708_v12, %v322_v43  ;;  %v481_v43 = vsel %vm206_vm0, %v480_v42, %v479_v41 }
 0x315   :  { %2075 = vmatmul.msk.f32.vlgmr.msrb.gmra.mxu2 %vm208_vm1, %v481_v43 }
 0x316   :  { %2157 = vtanh.f32 %v324_v44  ;;  %v2070_v46 = vmul.f32 -1.442695, %v324_v44  ;;  %858 = vmatpush.msrb.mxu2 %v2662_v3 }
 0x318   :  { %2159 = vpow2.f32 %v2070_v46  ;;  %859 = vmatpush.msrb.mxu2 %v2664_v4 }
 0x31c   :  { %v2158_v45 = vpop.eup %2157 }
 0x31d   :  { %347 = vrot.lane.b32.xlu2 %v2158_v45, %s2566_s6 }
 0x31e   :  { %v2160_v47 = vpop.eup %2159 }
 0x31f   :  { %v328_v48 = vadd.f32 1.0, %v2160_v47 }
 0x321   :  { %2161 = vrcp.f32 %v328_v48  ;;  %v340_v54 = vand.u32 2147483648, %v328_v48  ;;  %vm334_vm9 = vweird.f32 %v328_v48  ;;  %v338_v55 = vand.u32 2147483647, %v328_v48 }
 0x323   :  { %v341_v57 = vor.u32 1.1754944e-38, %v340_v54  ;;  %vm339_vm11 = vcmp.eq.f32.partialorder %v338_v55, 8.507059e+37 }
 0x327   :  { %v2162_v49 = vpop.eup %2161 }
 0x328   :  { %v330_v50 = vmul.f32 %v2162_v49, %v328_v48  ;;  %vm335_vm8 = vweird.f32 %v2162_v49 }
 0x329   :  { %vm336_vm10 = vmor %vm334_vm9, %vm335_vm8 }
 0x32a   :  { %v331_v51 = vsub.f32 1.0, %v330_v50 }
 0x32c   :  { %v332_v52 = vmul.f32 %v2162_v49, %v331_v51 }
 0x32e   :  { %v333_v53 = vadd.f32 %v2162_v49, %v332_v52 }
 0x330   :  { %v337_v56 = vsel %vm336_vm10, %v2162_v49, %v333_v53 }
 0x331   :  { %v342_v59 = vsel %vm339_vm11, %v341_v57, %v337_v56 }
 0x332   :  { %v345_v61 = vmul.f32 %v342_v59, %v265_v34 }
 0x377   :  { %v348_v58 = vpop.permute.xlu2 %347 }
 0x378   :  { %v350_v60 = vmul.f32 %v348_v58, %v342_v59 }
 0x37a   :  { %352 = vrot.lane.b32.xlu2 %v350_v60, %s2567_s7 }
 0x398   :  { %v501_v3 = vpop.f32.mrf.mxu2 }
 0x3d4   :  { %v353_v62 = vpop.permute.xlu2 %352 }
 0x3d5   :  { %v355_v63 = vadd.f32 %v353_v62, %v345_v61 }
 0x3d7   :  { %2163 = vtanh.f32 %v355_v63 }
 0x3dd   :  { %v2164_v7 = vpop.eup %2163 }
 0x3de   :  { %358 = vrot.lane.b32.xlu0 %v2164_v7, %s2566_s6 }
 0x450   :  { %v359_v14 = vpop.permute.xlu0 %358 }
 0x451   :  { %v361_v15 = vmul.f32 %v359_v14, %v342_v59  ;;  %v660_v14 = vrot.slane %v2670_v6, 4 }
 0x453   :  { %363 = vrot.lane.b32.xlu1 %v361_v15, %s2567_s7  ;;  %v2770_v15 = vld [vmem:[#allocation12 + $0x78] sm:$0xff] }
 0x4c5   :  { %v364_v16 = vpop.permute.xlu1 %363 }
 0x4c6   :  { %366 = vst.msk [vmem:[#allocation2 + $0x2] sm:$0x3] %vm276_vm6, %v364_v16  ;;  %2071 = vmatmul.msk.f32.vlgmr.msrb.gmra.mxu1 %vm179_vm7, %v364_v16  ;;  %v571_v16 = vsel %vm206_vm0, %v570_v11, %v569_v9 }
 0x4c7   :  { %741 = vmatpush.msrb.mxu1 %v2655_v0  ;;  %2078 = vmatmul.msk.f32.vlgmr.msra.gmra.mxu3 %vm208_vm1, %v571_v16 }
 0x4c9   :  { %742 = vmatpush.msrb.mxu1 %v2657_v1 }
 0x4cb   :  { %743 = vmatpush.msrb.mxu1 %v2660_v2 }
 0x4cd   :  { %744 = vmatpush.msrb.mxu1 %v2676_v8 }
 0x543   :  { %v386_v18 = vpop.f32.mrf.mxu1 }
 0x544   :  { %v412_v19 = vadd.f32 %v411_v17, %v386_v18  ;;  %v661_v17 = vsel %vm206_vm0, %v660_v14, %v659_v13  ;;  %v2776_v18 = vld [vmem:[#allocation12 + $0x68] sm:$0xff] }
 0x545   :  { %2081 = vmatmul.msk.f32.vlgmr.msra.gmra.mxu2 %vm208_vm1, %v661_v17 }
 0x546   :  { %v414_v20 = vadd.f32 %v2708_v12, %v412_v19  ;;  %1006 = vmatpush.msra.mxu2 %v2770_v15  ;;  %v2779_v19 = vld [vmem:[#allocation12 + $0x58] sm:$0xff] }
 0x548   :  { %2165 = vtanh.f32 %v414_v20  ;;  %v2073_v22 = vmul.f32 -1.442695, %v414_v20  ;;  %1007 = vmatpush.msra.mxu2 %v2776_v18 }
 0x54a   :  { %2167 = vpow2.f32 %v2073_v22  ;;  %1008 = vmatpush.msra.mxu2 %v2779_v19  ;;  %v749_v22 = vrot.slane %v2668_v5, 6 }
 0x54e   :  { %v2166_v21 = vpop.eup %2165 }
 0x54f   :  { %437 = vrot.lane.b32.xlu2 %v2166_v21, %s2566_s6 }
 0x550   :  { %v2168_v23 = vpop.eup %2167 }
 0x551   :  { %v418_v24 = vadd.f32 1.0, %v2168_v23  ;;  %v750_v23 = vrot.slane %v2670_v6, 5 }
 0x553   :  { %2169 = vrcp.f32 %v418_v24  ;;  %v430_v30 = vand.u32 2147483648, %v418_v24  ;;  %vm424_vm13 = vweird.f32 %v418_v24  ;;  %v428_v31 = vand.u32 2147483647, %v418_v24 }
 0x555   :  { %v431_v33 = vor.u32 1.1754944e-38, %v430_v30  ;;  %vm429_vm15 = vcmp.eq.f32.partialorder %v428_v31, 8.507059e+37  ;;  %v2794_v31 = vld [vmem:[#allocation12 + $0x38] sm:$0xff] }
 0x559   :  { %v2170_v25 = vpop.eup %2169 }
 0x55a   :  { %v420_v26 = vmul.f32 %v2170_v25, %v418_v24  ;;  %vm425_vm12 = vweird.f32 %v2170_v25  ;;  %v751_v24 = vsel %vm206_vm0, %v750_v23, %v749_v22 }
 0x55b   :  { %vm426_vm14 = vmor %vm424_vm13, %vm425_vm12  ;;  %2084 = vmatmul.msk.f32.vlgmr.msrb.gmra.mxu3 %vm208_vm1, %v751_v24 }
 0x55c   :  { %v421_v27 = vsub.f32 1.0, %v420_v26  ;;  %v840_v26 = vrot.slane %v2670_v6, 6  ;;  %v2800_v6 = vld [vmem:[#allocation12 + $0x18] sm:$0xff] }
 0x55e   :  { %v422_v28 = vmul.f32 %v2170_v25, %v421_v27  ;;  %v916_v27 = vld [vmem:[#allocation11 + $0x38] sm:$0xff] }
 0x55f   :  { %964 = vmatpush.msra.mxu3 %v916_v27 }
 0x560   :  { %v423_v29 = vadd.f32 %v2170_v25, %v422_v28  ;;  %v2790_v28 = vld [vmem:[#allocation12 + $0x48] sm:$0xff] }
 0x561   :  { %1009 = vmatpush.msra.mxu2 %v2790_v28 }
 0x562   :  { %v427_v32 = vsel %vm426_vm14, %v2170_v25, %v423_v29  ;;  %v839_v25 = vrot.slane %v2668_v5, 7  ;;  %v914_v29 = vld [vmem:[#allocation11 + $0x28] sm:$0xff] }
 0x563   :  { %v432_v35 = vsel %vm429_vm15, %v431_v33, %v427_v32  ;;  %v912_v32 = vld [vmem:[#allocation11 + $0x18] sm:$0xff]  ;;  %v2797_v33 = vld [vmem:[#allocation12 + $0x28] sm:$0xff]  ;;  %965 = vmatpush.msra.mxu3 %v914_v29  ;;  %1010 = vmatpush.msra.mxu2 %v2794_v31 }
 0x564   :  { %v435_v37 = vmul.f32 %v432_v35, %v355_v63  ;;  %v841_v30 = vsel %vm206_vm0, %v840_v26, %v839_v25  ;;  %v910_v5 = vld [vmem:[#allocation11 + $0x8] sm:$0xff] }
 0x565   :  { %2087 = vmatmul.msk.f32.vlgmr.msrb.gmra.mxu2 %vm208_vm1, %v841_v30  ;;  %966 = vmatpush.msra.mxu3 %v912_v32 }
 0x566   :  { %1011 = vmatpush.msra.mxu2 %v2797_v33 }
 0x567   :  { %967 = vmatpush.msra.mxu3 %v910_v5 }
 0x568   :  { %1012 = vmatpush.msra.mxu2 %v2800_v6 }
 0x569   :  { %1109 = vmatpush.msrb.mxu3 %v2770_v15 }
 0x56b   :  { %1110 = vmatpush.msrb.mxu3 %v2776_v18 }
 0x56d   :  { %1111 = vmatpush.msrb.mxu3 %v2779_v19 }
 0x56f   :  { %1112 = vmatpush.msrb.mxu3 %v2790_v28 }
 0x571   :  { %1113 = vmatpush.msrb.mxu3 %v2794_v31 }
 0x573   :  { %1114 = vmatpush.msrb.mxu3 %v2797_v33 }
 0x575   :  { %1115 = vmatpush.msrb.mxu3 %v2800_v6 }
 0x5a9   :  { %v438_v34 = vpop.permute.xlu2 %437 }
 0x5aa   :  { %v440_v36 = vmul.f32 %v438_v34, %v432_v35  ;;  %v2804_v34 = vld [vmem:[#allocation12 + $0x8] sm:$0xff] }
 0x5ab   :  { %1013 = vmatpush.msra.mxu2 %v2804_v34  ;;  %1116 = vmatpush.msrb.mxu3 %v2804_v34 }
 0x5ac   :  { %442 = vrot.lane.b32.xlu0 %v440_v36, %s2567_s7  ;;  %1014 = vmatmul.f32.vlgmr.msra.gmra.mxu2 %v2565_v10 }
 0x61e   :  { %v443_v38 = vpop.permute.xlu0 %442 }
 0x61f   :  { %v445_v39 = vadd.f32 %v443_v38, %v435_v37  ;;  %v591_v37 = vpop.f32.mrf.mxu3 }
 0x621   :  { %2171 = vtanh.f32 %v445_v39 }
 0x627   :  { %v2172_v40 = vpop.eup %2171 }
 0x628   :  { %448 = vrot.lane.b32.xlu1 %v2172_v40, %s2566_s6 }
 0x69a   :  { %v449_v44 = vpop.permute.xlu1 %448 }
 0x69b   :  { %v451_v45 = vmul.f32 %v449_v44, %v432_v35 }
 0x69d   :  { %453 = vrot.lane.b32.xlu2 %v451_v45, %s2567_s7 }
 0x6f7   :  { %v454_v46 = vpop.permute.xlu2 %453 }
 0x6f8   :  { %456 = vst.msk [vmem:[#allocation2 + $0x4] sm:$0x3] %vm276_vm6, %v454_v46  ;;  %2074 = vmatmul.msk.f32.vlgmr.msrb.gmra.mxu0 %vm179_vm7, %v454_v46 }
 0x6f9   :  { %831 = vmatpush.msrb.mxu0 %v2655_v0 }
 0x6fb   :  { %832 = vmatpush.msrb.mxu0 %v2657_v1 }
 0x6fd   :  { %833 = vmatpush.msrb.mxu0 %v2660_v2 }
 0x6ff   :  { %834 = vmatpush.msrb.mxu0 %v2676_v8 }
 0x775   :  { %v476_v47 = vpop.f32.mrf.mxu0 }
 0x776   :  { %v502_v4 = vadd.f32 %v501_v3, %v476_v47 }
 0x778   :  { %v504_v48 = vadd.f32 %v2708_v12, %v502_v4 }
 0x77a   :  { %2173 = vtanh.f32 %v504_v48  ;;  %v2076_v50 = vmul.f32 -1.442695, %v504_v48 }
 0x77c   :  { %2175 = vpow2.f32 %v2076_v50 }
 0x780   :  { %v2174_v49 = vpop.eup %2173 }
 0x781   :  { %527 = vrot.lane.b32.xlu0 %v2174_v49, %s2566_s6 }
 0x782   :  { %v2176_v51 = vpop.eup %2175 }
 0x783   :  { %v508_v52 = vadd.f32 1.0, %v2176_v51 }
 0x785   :  { %2177 = vrcp.f32 %v508_v52  ;;  %v520_v8 = vand.u32 2147483648, %v508_v52  ;;  %vm514_vm3 = vweird.f32 %v508_v52  ;;  %v518_v55 = vand.u32 2147483647, %v508_v52 }
 0x787   :  { %v521_v57 = vor.u32 1.1754944e-38, %v520_v8  ;;  %vm519_vm5 = vcmp.eq.f32.partialorder %v518_v55, 8.507059e+37 }
 0x78b   :  { %v2178_v0 = vpop.eup %2177 }
 0x78c   :  { %v510_v1 = vmul.f32 %v2178_v0, %v508_v52  ;;  %vm515_vm2 = vweird.f32 %v2178_v0 }
 0x78d   :  { %vm516_vm4 = vmor %vm514_vm3, %vm515_vm2 }
 0x78e   :  { %v511_v53 = vsub.f32 1.0, %v510_v1 }
 0x790   :  { %v512_v2 = vmul.f32 %v2178_v0, %v511_v53 }
 0x792   :  { %v513_v54 = vadd.f32 %v2178_v0, %v512_v2 }
 0x794   :  { %v517_v56 = vsel %vm516_vm4, %v2178_v0, %v513_v54 }
 0x795   :  { %v522_v59 = vsel %vm519_vm5, %v521_v57, %v517_v56 }
 0x796   :  { %v525_v61 = vmul.f32 %v522_v59, %v445_v39 }
 0x7f3   :  { %v528_v58 = vpop.permute.xlu0 %527 }
 0x7f4   :  { %v530_v60 = vmul.f32 %v528_v58, %v522_v59  ;;  %v681_v58 = vpop.f32.mrf.mxu2 }
 0x7f6   :  { %532 = vrot.lane.b32.xlu1 %v530_v60, %s2567_s7 }
 0x868   :  { %v533_v62 = vpop.permute.xlu1 %532 }
 0x869   :  { %v2762_v63 = vadd.f32 %v533_v62, %v525_v61 }
 0x86b   :  { %2179 = vtanh.f32 %v2762_v63 }
 0x871   :  { %v2180_v7 = vpop.eup %2179 }
 0x872   :  { %538 = vrot.lane.b32.xlu2 %v2180_v7, %s2566_s6 }
 0x8cc   :  { %v539_v20 = vpop.permute.xlu2 %538 }
 0x8cd   :  { %v541_v21 = vmul.f32 %v539_v20, %v522_v59 }
 0x8cf   :  { %543 = vrot.lane.b32.xlu0 %v541_v21, %s2567_s7 }
 0x941   :  { %v544_v35 = vpop.permute.xlu0 %543 }
 0x942   :  { %546 = vst.msk [vmem:[#allocation2 + $0x6] sm:$0x3] %vm276_vm6, %v544_v35  ;;  %2077 = vmatmul.msk.f32.vlgmr.msra.gmra.mxu1 %vm179_vm7, %v544_v35 }
 0x949   :  { %v2818_v36 = vld [vmem:[#allocation2] sm:$0xff] }
 0x94a   :  { %2091 = vmatmul.msk.f32.vlgmr.msra.gmra.mxu3 %vm179_vm7, %v2818_v36 }
 0x94b   :  { %1263 = vmatpush.msra.mxu3 %v2770_v15 }
 0x94d   :  { %1264 = vmatpush.msra.mxu3 %v2776_v18 }
 0x94f   :  { %1265 = vmatpush.msra.mxu3 %v2779_v19 }
 0x951   :  { %1266 = vmatpush.msra.mxu3 %v2790_v28 }
 0x953   :  { %1267 = vmatpush.msra.mxu3 %v2794_v31 }
 0x955   :  { %1268 = vmatpush.msra.mxu3 %v2797_v33 }
 0x957   :  { %1269 = vmatpush.msra.mxu3 %v2800_v6 }
 0x959   :  { %1270 = vmatpush.msra.mxu3 %v2804_v34 }
 0x9bf   :  { %v566_v38 = vpop.f32.mrf.mxu1 }
 0x9c0   :  { %v592_v39 = vadd.f32 %v591_v37, %v566_v38  ;;  %v915_v37 = vld [vmem:[#allocation11 + $0x30] sm:$0xff]  ;;  %v913_v38 = vld [vmem:[#allocation11 + $0x20] sm:$0xff] }
 0x9c1   :  { %941 = vmatpush.msra.mxu1 %v915_v37 }
 0x9c2   :  { %v594_v40 = vadd.f32 %v2708_v12, %v592_v39  ;;  %v911_v39 = vld [vmem:[#allocation11 + $0x10] sm:$0xff] }
 0x9c3   :  { %942 = vmatpush.msra.mxu1 %v913_v38 }
 0x9c4   :  { %2181 = vtanh.f32 %v594_v40  ;;  %v2079_v42 = vmul.f32 -1.442695, %v594_v40  ;;  %v909_v40 = vld [vmem:[#allocation11] sm:$0xff] }
 0x9c5   :  { %943 = vmatpush.msra.mxu1 %v911_v39 }
 0x9c6   :  { %2183 = vpow2.f32 %v2079_v42  ;;  %v771_v42 = vpop.f32.mrf.mxu3 }
 0x9c7   :  { %944 = vmatpush.msra.mxu1 %v909_v40 }
 0x9ca   :  { %v2182_v41 = vpop.eup %2181 }
 0x9cb   :  { %617 = vrot.lane.b32.xlu1 %v2182_v41, %s2566_s6 }
 0x9cc   :  { %v2184_v43 = vpop.eup %2183 }
 0x9cd   :  { %v598_v44 = vadd.f32 1.0, %v2184_v43 }
 0x9ce   :  { %v969_v37 = vpop.f32.mrf.mxu3 }
 0x9cf   :  { %2185 = vrcp.f32 %v598_v44  ;;  %v610_v48 = vand.u32 2147483648, %v598_v44  ;;  %vm604_vm1 = vweird.f32 %v598_v44  ;;  %v608_v49 = vand.u32 2147483647, %v598_v44 }
 0x9d1   :  { %v611_v51 = vor.u32 1.1754944e-38, %v610_v48  ;;  %vm609_vm9 = vcmp.eq.f32.partialorder %v608_v49, 8.507059e+37 }
 0x9d5   :  { %v2186_v45 = vpop.eup %2185 }
 0x9d6   :  { %v600_v46 = vmul.f32 %v2186_v45, %v598_v44  ;;  %vm605_vm0 = vweird.f32 %v2186_v45 }
 0x9d7   :  { %vm606_vm8 = vmor %vm604_vm1, %vm605_vm0 }
 0x9d8   :  { %v601_v3 = vsub.f32 1.0, %v600_v46 }
 0x9da   :  { %v602_v47 = vmul.f32 %v2186_v45, %v601_v3 }
 0x9dc   :  { %v603_v4 = vadd.f32 %v2186_v45, %v602_v47 }
 0x9de   :  { %v607_v50 = vsel %vm606_vm8, %v2186_v45, %v603_v4 }
 0x9df   :  { %v612_v0 = vsel %vm609_vm9, %v611_v51, %v607_v50 }
 0x9e0   :  { %v615_v53 = vmul.f32 %v612_v0, %v2762_v63 }
 0xa3d   :  { %v618_v52 = vpop.permute.xlu1 %617 }
 0xa3e   :  { %v620_v1 = vmul.f32 %v618_v52, %v612_v0 }
 0xa40   :  { %622 = vrot.lane.b32.xlu2 %v620_v1, %s2567_s7 }
 0xa9a   :  { %v623_v2 = vpop.permute.xlu2 %622 }
 0xa9b   :  { %v625_v54 = vadd.f32 %v623_v2, %v615_v53 }
 0xa9d   :  { %2187 = vtanh.f32 %v625_v54 }
 0xaa3   :  { %v2188_v8 = vpop.eup %2187 }
 0xaa4   :  { %628 = vrot.lane.b32.xlu0 %v2188_v8, %s2566_s6 }
 0xb16   :  { %v629_v55 = vpop.permute.xlu0 %628 }
 0xb17   :  { %v631_v56 = vmul.f32 %v629_v55, %v612_v0 }
 0xb19   :  { %633 = vrot.lane.b32.xlu1 %v631_v56, %s2567_s7 }
 0xb8b   :  { %v634_v57 = vpop.permute.xlu1 %633 }
 0xb8c   :  { %636 = vst.msk [vmem:[#allocation2 + $0x8] sm:$0x3] %vm276_vm6, %v634_v57  ;;  %2080 = vmatmul.msk.f32.vlgmr.msra.gmra.mxu0 %vm179_vm7, %v634_v57 }
 0xc09   :  { %v656_v59 = vpop.f32.mrf.mxu0 }
 0xc0a   :  { %v682_v60 = vadd.f32 %v681_v58, %v656_v59  ;;  %v2854_v59 = vld [vmem:[#allocation12 + $0x70] sm:$0xff] }
 0xc0b   :  { %986 = vmatpush.msra.mxu0 %v2854_v59 }
 0xc0c   :  { %v684_v61 = vadd.f32 %v2708_v12, %v682_v60  ;;  %v2856_v60 = vld [vmem:[#allocation12 + $0x60] sm:$0xff] }
 0xc0d   :  { %987 = vmatpush.msra.mxu0 %v2856_v60 }
 0xc0e   :  { %2189 = vtanh.f32 %v684_v61  ;;  %v2082_v63 = vmul.f32 -1.442695, %v684_v61  ;;  %v2860_v61 = vld [vmem:[#allocation12 + $0x50] sm:$0xff] }
 0xc0f   :  { %988 = vmatpush.msra.mxu0 %v2860_v61 }
 0xc10   :  { %2191 = vpow2.f32 %v2082_v63 }
 0xc14   :  { %v2190_v62 = vpop.eup %2189 }
 0xc15   :  { %707 = vrot.lane.b32.xlu2 %v2190_v62, %s2566_s6  ;;  %v2864_v62 = vld [vmem:[#allocation12 + $0x40] sm:$0xff] }
 0xc16   :  { %v2192_v7 = vpop.eup %2191  ;;  %989 = vmatpush.msra.mxu0 %v2864_v62 }
 0xc17   :  { %v688_v9 = vadd.f32 1.0, %v2192_v7 }
 0xc19   :  { %2193 = vrcp.f32 %v688_v9  ;;  %v700_v20 = vand.u32 2147483648, %v688_v9  ;;  %vm694_vm11 = vweird.f32 %v688_v9  ;;  %v698_v21 = vand.u32 2147483647, %v688_v9 }
 0xc1b   :  { %v701_v23 = vor.u32 1.1754944e-38, %v700_v20  ;;  %vm699_vm13 = vcmp.eq.f32.partialorder %v698_v21, 8.507059e+37 }
 0xc1f   :  { %v2194_v11 = vpop.eup %2193 }
 0xc20   :  { %v690_v13 = vmul.f32 %v2194_v11, %v688_v9  ;;  %vm695_vm10 = vweird.f32 %v2194_v11  ;;  %v2871_v9 = vld [vmem:[#allocation12 + $0x30] sm:$0xff] }
 0xc21   :  { %vm696_vm12 = vmor %vm694_vm11, %vm695_vm10  ;;  %990 = vmatpush.msra.mxu0 %v2871_v9 }
 0xc22   :  { %v691_v14 = vsub.f32 1.0, %v690_v13  ;;  %v2877_v13 = vld [vmem:[#allocation12 + $0x10] sm:$0xff] }
 0xc24   :  { %v692_v16 = vmul.f32 %v2194_v11, %v691_v14  ;;  %v2881_v14 = vld [vmem:[#allocation12] sm:$0xff] }
 0xc26   :  { %v693_v17 = vadd.f32 %v2194_v11, %v692_v16 }
 0xc28   :  { %v697_v22 = vsel %vm696_vm12, %v2194_v11, %v693_v17  ;;  %v2873_v11 = vld [vmem:[#allocation12 + $0x20] sm:$0xff]  ;;  %v861_v17 = vpop.f32.mrf.mxu2 }
 0xc29   :  { %v702_v25 = vsel %vm699_vm13, %v701_v23, %v697_v22  ;;  %991 = vmatpush.msra.mxu0 %v2873_v11  ;;  %v2898_v22 = vld [vmem:[#allocation14] sm:$0x3] }
 0xc2a   :  { %v705_v27 = vmul.f32 %v702_v25, %v625_v54  ;;  %v919_v23 = vperm.slane %v2898_v22, 0 }
 0xc2b   :  { %992 = vmatpush.msra.mxu0 %v2877_v13 }
 0xc2d   :  { %993 = vmatpush.msra.mxu0 %v2881_v14 }
 0xc30   :  { %v1015_v38 = vpop.f32.mrf.mxu2 }
 0xc6f   :  { %v708_v24 = vpop.permute.xlu2 %707 }
 0xc70   :  { %v710_v26 = vmul.f32 %v708_v24, %v702_v25 }
 0xc72   :  { %712 = vrot.lane.b32.xlu0 %v710_v26, %s2567_s7 }
 0xce4   :  { %v713_v29 = vpop.permute.xlu0 %712 }
 0xce5   :  { %v715_v30 = vadd.f32 %v713_v29, %v705_v27 }
 0xce7   :  { %2195 = vtanh.f32 %v715_v30 }
 0xced   :  { %v2196_v32 = vpop.eup %2195 }
 0xcee   :  { %718 = vrot.lane.b32.xlu1 %v2196_v32, %s2566_s6 }
 0xd60   :  { %v719_v5 = vpop.permute.xlu1 %718 }
 0xd61   :  { %v721_v35 = vmul.f32 %v719_v5, %v702_v25  ;;  %v920_v5 = vperm.slane %v2898_v22, 1 }
 0xd63   :  { %723 = vrot.lane.b32.xlu2 %v721_v35, %s2567_s7 }
 0xdbd   :  { %v724_v41 = vpop.permute.xlu2 %723 }
 0xdbe   :  { %726 = vst.msk [vmem:[#allocation2 + $0xa] sm:$0x3] %vm276_vm6, %v724_v41  ;;  %2083 = vmatmul.msk.f32.vlgmr.msrb.gmra.mxu1 %vm179_vm7, %v724_v41 }
 0xdbf   :  { %1089 = vmatpush.msrb.mxu1 %v2854_v59 }
 0xdc1   :  { %1090 = vmatpush.msrb.mxu1 %v2856_v60 }
 0xdc3   :  { %1091 = vmatpush.msrb.mxu1 %v2860_v61 }
 0xdc5   :  { %1092 = vmatpush.msrb.mxu1 %v2864_v62 }
 0xdc6   :  { %2089 = vmatmul.msk.f32.vlgmr.msra.gmra.mxu1 %vm179_vm7, %v2818_v36 }
 0xdc7   :  { %1093 = vmatpush.msrb.mxu1 %v2871_v9 }
 0xdc9   :  { %1094 = vmatpush.msrb.mxu1 %v2873_v11 }
 0xdcb   :  { %1095 = vmatpush.msrb.mxu1 %v2877_v13 }
 0xdcd   :  { %1096 = vmatpush.msrb.mxu1 %v2881_v14 }
 0xdcf   :  { %1243 = vmatpush.msra.mxu1 %v2854_v59 }
 0xdd1   :  { %1244 = vmatpush.msra.mxu1 %v2856_v60 }
 0xdd3   :  { %1245 = vmatpush.msra.mxu1 %v2860_v61 }
 0xdd5   :  { %1246 = vmatpush.msra.mxu1 %v2864_v62 }
 0xdd7   :  { %1247 = vmatpush.msra.mxu1 %v2871_v9 }
 0xdd9   :  { %1248 = vmatpush.msra.mxu1 %v2873_v11 }
 0xddb   :  { %1249 = vmatpush.msra.mxu1 %v2877_v13 }
 0xddd   :  { %1250 = vmatpush.msra.mxu1 %v2881_v14 }
 0xe3b   :  { %v746_v43 = vpop.f32.mrf.mxu1 }
 0xe3c   :  { %v772_v44 = vadd.f32 %v771_v42, %v746_v43 }
 0xe3e   :  { %v774_v45 = vadd.f32 %v2708_v12, %v772_v44 }
 0xe40   :  { %2197 = vtanh.f32 %v774_v45  ;;  %v2085_v3 = vmul.f32 -1.442695, %v774_v45 }
 0xe42   :  { %2199 = vpow2.f32 %v2085_v3 }
 0xe43   :  { %v946_v25 = vpop.f32.mrf.mxu1 }
 0xe44   :  { %v2904_v26 = vadd.f32 %v946_v25, %v919_v23 }
 0xe46   :  { %v2198_v46 = vpop.eup %2197 }
 0xe47   :  { %797 = vrot.lane.b32.xlu0 %v2198_v46, %s2566_s6 }
 0xe48   :  { %v2200_v47 = vpop.eup %2199 }
 0xe49   :  { %v778_v4 = vadd.f32 1.0, %v2200_v47 }
 0xe4b   :  { %2201 = vrcp.f32 %v778_v4  ;;  %v790_v36 = vand.u32 2147483648, %v778_v4  ;;  %vm784_vm15 = vweird.f32 %v778_v4  ;;  %v788_v0 = vand.u32 2147483647, %v778_v4 }
 0xe4d   :  { %v791_v53 = vor.u32 1.1754944e-38, %v790_v36  ;;  %vm789_vm3 = vcmp.eq.f32.partialorder %v788_v0, 8.507059e+37 }
 0xe51   :  { %v2202_v48 = vpop.eup %2201 }
 0xe52   :  { %v780_v49 = vmul.f32 %v2202_v48, %v778_v4  ;;  %vm785_vm14 = vweird.f32 %v2202_v48 }
 0xe53   :  { %vm786_vm2 = vmor %vm784_vm15, %vm785_vm14 }
 0xe54   :  { %v781_v50 = vsub.f32 1.0, %v780_v49 }
 0xe56   :  { %v782_v51 = vmul.f32 %v2202_v48, %v781_v50 }
 0xe58   :  { %v783_v52 = vadd.f32 %v2202_v48, %v782_v51 }
 0xe5a   :  { %v787_v1 = vsel %vm786_vm2, %v2202_v48, %v783_v52  ;;  %vm975_vm2 = vcmask 523264  }
 0xe5b   :  { %v792_v54 = vsel %vm789_vm3, %v791_v53, %v787_v1 }
 0xe5c   :  { %v795_v55 = vmul.f32 %v792_v54, %v715_v30 }
 0xeb9   :  { %v798_v2 = vpop.permute.xlu0 %797 }
 0xeba   :  { %v800_v8 = vmul.f32 %v798_v2, %v792_v54 }
 0xebc   :  { %802 = vrot.lane.b32.xlu1 %v800_v8, %s2567_s7 }
 0xf2e   :  { %v803_v56 = vpop.permute.xlu1 %802 }
 0xf2f   :  { %v2850_v57 = vadd.f32 %v803_v56, %v795_v55 }
 0xf31   :  { %2203 = vtanh.f32 %v2850_v57 }
 0xf37   :  { %v2204_v58 = vpop.eup %2203 }
 0xf38   :  { %808 = vrot.lane.b32.xlu2 %v2204_v58, %s2566_s6 }
 0xf92   :  { %v809_v63 = vpop.permute.xlu2 %808 }
 0xf93   :  { %v811_v7 = vmul.f32 %v809_v63, %v792_v54 }
 0xf95   :  { %813 = vrot.lane.b32.xlu0 %v811_v7, %s2567_s7 }
0x1007   :  { %v814_v16 = vpop.permute.xlu0 %813 }
0x1008   :  { %816 = vst.msk [vmem:[#allocation2 + $0xc] sm:$0x3] %vm276_vm6, %v814_v16  ;;  %2086 = vmatmul.msk.f32.vlgmr.msrb.gmra.mxu0 %vm179_vm7, %v814_v16 }
0x1010   :  { %994 = vmatmul.f32.vlgmr.msra.gmra.mxu0 %v2565_v10 }
0x1085   :  { %v836_v20 = vpop.f32.mrf.mxu0 }
0x1086   :  { %v862_v21 = vadd.f32 %v861_v17, %v836_v20 }
0x1088   :  { %v864_v24 = vadd.f32 %v2708_v12, %v862_v21  ;;  %v2911_v12 = vadd.f32 %v969_v37, %v920_v5 }
0x108a   :  { %2205 = vtanh.f32 %v864_v24  ;;  %v1019_v40 = vadd.f32 %v1015_v38, %v2911_v12  ;;  %v2088_v50 = vmul.f32 -1.442695, %v864_v24 }
0x108c   :  { %v2094_v2 = vmul.f32 -1.442695, %v1019_v40 }
0x108d   :  { %v995_v27 = vpop.f32.mrf.mxu0 }
0x108e   :  { %v1018_v29 = vadd.f32 %v995_v27, %v2904_v26 }
0x1090   :  { %v2206_v30 = vpop.eup %2205  ;;  %v2093_v10 = vmul.f32 -1.442695, %v1018_v29 }
0x1091   :  { %887 = vrot.lane.b32.xlu1 %v2206_v30, %s2566_s6 }
0x1092   :  { %2207 = vpow2.f32 %v2093_v10 }
0x1098   :  { %v2208_v32 = vpop.eup %2207 }
0x1099   :  { %v1023_v35 = vadd.f32 1.0, %v2208_v32 }
0x109b   :  { %2209 = vrcp.f32 %v1023_v35  ;;  %v1035_v43 = vand.u32 2147483648, %v1023_v35  ;;  %v1033_v45 = vand.u32 2147483647, %v1023_v35  ;;  %vm1029_vm5 = vweird.f32 %v1023_v35 }
0x109c   :  { %2211 = vtanh.f32 %v1019_v40 }
0x109d   :  { %v1036_v3 = vor.u32 1.1754944e-38, %v1035_v43  ;;  %vm1034_vm1 = vcmp.eq.f32.partialorder %v1033_v45, 8.507059e+37  ;;  %2213 = vpow2.f32 %v2088_v50  ;;  %v1075_v43 = vld [vmem:[#allocation15 + $0x38] sm:$0xff]  ;;  %v1073_v45 = vld [vmem:[#allocation15 + $0x28] sm:$0xff]  ;;  %v1070_v50 = vld [vmem:[#allocation15 + $0x10] sm:$0xff] }
0x109e   :  { %1223 = vmatpush.msrb.mxu2 %v1075_v43  ;;  %v1184_v43 = vld [vmem:[#allocation15 + $0x58] sm:$0xff] }
0x10a1   :  { %v2210_v39 = vpop.eup %2209 }
0x10a2   :  { %v1025_v41 = vmul.f32 %v2210_v39, %v1023_v35  ;;  %vm1030_vm4 = vweird.f32 %v2210_v39  ;;  %v2212_v4 = vpop.eup %2211 }
0x10a3   :  { %vm1031_vm0 = vmor %vm1029_vm5, %vm1030_vm4  ;;  %v2214_v51 = vpop.eup %2213 }
0x10a4   :  { %v1026_v42 = vsub.f32 1.0, %v1025_v41  ;;  %v868_v52 = vadd.f32 1.0, %v2214_v51  ;;  %v1069_v51 = vld [vmem:[#allocation15 + $0x8] sm:$0xff] }
0x10a6   :  { %v1027_v44 = vmul.f32 %v2210_v39, %v1026_v42  ;;  %2215 = vrcp.f32 %v868_v52  ;;  %v880_v8 = vand.u32 2147483648, %v868_v52  ;;  %vm874_vm9 = vweird.f32 %v868_v52 }
0x10a7   :  { %v878_v55 = vand.u32 2147483647, %v868_v52  ;;  %2217 = vpow2.f32 %v2094_v2 }
0x10a8   :  { %v1028_v46 = vadd.f32 %v2210_v39, %v1027_v44  ;;  %v881_v58 = vor.u32 1.1754944e-38, %v880_v8  ;;  %v1074_v44 = vld [vmem:[#allocation15 + $0x30] sm:$0xff] }
0x10a9   :  { %vm879_vm11 = vcmp.eq.f32.partialorder %v878_v55, 8.507059e+37  ;;  %1224 = vmatpush.msrb.mxu2 %v1074_v44 }
0x10aa   :  { %v1032_v47 = vsel %vm1031_vm0, %v2210_v39, %v1028_v46  ;;  %v1072_v46 = vld [vmem:[#allocation15 + $0x20] sm:$0xff] }
0x10ab   :  { %v1037_v48 = vsel %vm1034_vm1, %v1036_v3, %v1032_v47  ;;  %1225 = vmatpush.msrb.mxu2 %v1073_v45  ;;  %v1183_v45 = vld [vmem:[#allocation15 + $0x50] sm:$0xff] }
0x10ac   :  { %v1060_v49 = vmul.f32 %v2212_v4, %v1037_v48  ;;  %v2216_v36 = vpop.eup %2215  ;;  %v1059_v29 = vmul.f32 0.0, %v1037_v48 }
0x10ad   :  { %v870_v0 = vmul.f32 %v2216_v36, %v868_v52  ;;  %vm875_vm8 = vweird.f32 %v2216_v36  ;;  %v2218_v17 = vpop.eup %2217  ;;  %1226 = vmatpush.msrb.mxu2 %v1072_v46  ;;  %v1068_v52 = vld [vmem:[#allocation15] sm:$0xff]  ;;  %v1182_v46 = vld [vmem:[#allocation15 + $0x48] sm:$0xff] }
0x10ae   :  { %1062 = vrot.lane.b32.xlu1 %v1060_v49, %s2566_s6  ;;  %vm876_vm10 = vmor %vm874_vm9, %vm875_vm8  ;;  %v1043_v20 = vadd.f32 1.0, %v2218_v17  ;;  %v1071_v49 = vld [vmem:[#allocation15 + $0x18] sm:$0xff] }
0x10af   :  { %v871_v1 = vsub.f32 1.0, %v870_v0  ;;  %1227 = vmatpush.msrb.mxu2 %v1071_v49 }
0x10b0   :  { %2219 = vrcp.f32 %v1043_v20  ;;  %v1055_v35 = vand.u32 2147483648, %v1043_v20  ;;  %vm1049_vm13 = vweird.f32 %v1043_v20  ;;  %v1053_v37 = vand.u32 2147483647, %v1043_v20 }
0x10b1   :  { %v872_v53 = vmul.f32 %v2216_v36, %v871_v1  ;;  %1228 = vmatpush.msrb.mxu2 %v1070_v50 }
0x10b2   :  { %v1056_v39 = vor.u32 1.1754944e-38, %v1055_v35  ;;  %vm1054_vm15 = vcmp.eq.f32.partialorder %v1053_v37, 8.507059e+37 }
0x10b3   :  { %v873_v54 = vadd.f32 %v2216_v36, %v872_v53  ;;  %1229 = vmatpush.msrb.mxu2 %v1069_v51 }
0x10b5   :  { %v877_v56 = vsel %vm876_vm10, %v2216_v36, %v873_v54  ;;  %1230 = vmatpush.msrb.mxu2 %v1068_v52 }
0x10b6   :  { %v882_v7 = vsel %vm879_vm11, %v881_v58, %v877_v56  ;;  %v2220_v21 = vpop.eup %2219 }
0x10b7   :  { %v1045_v24 = vmul.f32 %v2220_v21, %v1043_v20  ;;  %vm1050_vm12 = vweird.f32 %v2220_v21  ;;  %v885_v3 = vmul.f32 %v882_v7, %v2850_v57  ;;  %1378 = vmatpush.msra.mxu2 %v2854_v59 }
0x10b8   :  { %vm1051_vm14 = vmor %vm1049_vm13, %vm1050_vm12 }
0x10b9   :  { %v1046_v25 = vsub.f32 1.0, %v1045_v24  ;;  %1379 = vmatpush.msra.mxu2 %v2856_v60 }
0x10bb   :  { %v1047_v27 = vmul.f32 %v2220_v21, %v1046_v25  ;;  %1380 = vmatpush.msra.mxu2 %v2860_v61 }
0x10bd   :  { %v1048_v32 = vadd.f32 %v2220_v21, %v1047_v27  ;;  %1381 = vmatpush.msra.mxu2 %v2864_v62 }
0x10bf   :  { %v1052_v38 = vsel %vm1051_vm14, %v2220_v21, %v1048_v32  ;;  %1382 = vmatpush.msra.mxu2 %v2871_v9 }
0x10c0   :  { %v1057_v41 = vsel %vm1054_vm15, %v1056_v39, %v1052_v38  ;;  %v1188_v39 = vld [vmem:[#allocation15 + $0x78] sm:$0xff] }
0x10c1   :  { %1383 = vmatpush.msra.mxu2 %v2873_v11  ;;  %1203 = vmatpush.msrb.mxu0 %v1188_v39 }
0x10c3   :  { %1384 = vmatpush.msra.mxu2 %v2877_v13 }
0x10c5   :  { %1385 = vmatpush.msra.mxu2 %v2881_v14 }
0x1103   :  { %v888_v63 = vpop.permute.xlu1 %887 }
0x1104   :  { %v890_v16 = vmul.f32 %v888_v63, %v882_v7 }
0x1106   :  { %892 = vrot.lane.b32.xlu2 %v890_v16, %s2567_s7 }
0x1120   :  { %v1063_v30 = vpop.permute.xlu1 %1062 }
0x1121   :  { %v2916_v10 = vadd.f32 %v1063_v30, %v1059_v29 }
0x1123   :  { %2221 = vtanh.f32 %v2916_v10  ;;  %v1169_v24 = vrot.slane %v2916_v10, 6 }
0x1129   :  { %v2222_v40 = vpop.eup %2221 }
0x112a   :  { %v1067_v42 = vmul.f32 %v2222_v40, %v1057_v41  ;;  %v1187_v40 = vld [vmem:[#allocation15 + $0x70] sm:$0xff]  ;;  %v1186_v41 = vld [vmem:[#allocation15 + $0x68] sm:$0xff] }
0x112b   :  { %1204 = vmatpush.msrb.mxu0 %v1187_v40 }
0x112d   :  { %1205 = vmatpush.msrb.mxu0 %v1186_v41  ;;  %v1342_v41 = vld [vmem:[#allocation15 + $0xb8] sm:$0xff] }
0x1160   :  { %v893_v47 = vpop.permute.xlu2 %892 }
0x1161   :  { %v895_v4 = vadd.f32 %v893_v47, %v885_v3  ;;  %v1181_v47 = vld [vmem:[#allocation15 + $0x40] sm:$0xff] }
0x1163   :  { %2223 = vtanh.f32 %v895_v4 }
0x1169   :  { %v2224_v48 = vpop.eup %2223 }
0x116a   :  { %898 = vrot.lane.b32.xlu0 %v2224_v48, %s2566_s6 }
0x1172   :  { %1077 = vrot.lane.b32.xlu0 %v1067_v42, %s2566_s6  ;;  %v1185_v42 = vld [vmem:[#allocation15 + $0x60] sm:$0xff] }
0x1173   :  { %1206 = vmatpush.msrb.mxu0 %v1185_v42  ;;  %v1341_v42 = vld [vmem:[#allocation15 + $0xb0] sm:$0xff] }
0x1175   :  { %1207 = vmatpush.msrb.mxu0 %v1184_v43  ;;  %v1339_v43 = vld [vmem:[#allocation15 + $0xa0] sm:$0xff] }
0x1177   :  { %1208 = vmatpush.msrb.mxu0 %v1183_v45  ;;  %v1338_v45 = vld [vmem:[#allocation15 + $0x98] sm:$0xff] }
0x1179   :  { %1209 = vmatpush.msrb.mxu0 %v1182_v46 }
0x117b   :  { %1210 = vmatpush.msrb.mxu0 %v1181_v47  ;;  %v1336_v47 = vld [vmem:[#allocation15 + $0x88] sm:$0xff] }
0x117d   :  { %1357 = vmatpush.msra.mxu0 %v1342_v41 }
0x117f   :  { %1358 = vmatpush.msra.mxu0 %v1341_v42 }
0x11dc   :  { %v899_v57 = vpop.permute.xlu0 %898 }
0x11dd   :  { %v901_v36 = vmul.f32 %v899_v57, %v882_v7 }
0x11df   :  { %903 = vrot.lane.b32.xlu2 %v901_v36, %s2567_s7 }
0x11e4   :  { %v1078_v0 = vpop.permute.xlu0 %1077 }
0x11e5   :  { %2100 = vmatmul.msk.f32.vlgmr.msrb.gmra.mxu2 %vm975_vm2, %v1078_v0 }
0x11e6   :  { %1533 = vmatpush.msrb.mxu2 %v2770_v15 }
0x11e8   :  { %1534 = vmatpush.msrb.mxu2 %v2776_v18 }
0x11ea   :  { %1535 = vmatpush.msrb.mxu2 %v2779_v19 }
0x11ec   :  { %1536 = vmatpush.msrb.mxu2 %v2790_v28 }
0x11ee   :  { %1537 = vmatpush.msrb.mxu2 %v2794_v31 }
0x11f0   :  { %1538 = vmatpush.msrb.mxu2 %v2797_v33 }
0x11f2   :  { %1539 = vmatpush.msrb.mxu2 %v2800_v6 }
0x11f4   :  { %1540 = vmatpush.msrb.mxu2 %v2804_v34 }
0x1239   :  { %v904_v1 = vpop.permute.xlu2 %903 }
0x123a   :  { %906 = vst.msk [vmem:[#allocation2 + $0xe] sm:$0x3] %vm276_vm6, %v904_v1 }
0x1241   :  { %v908_v53 = vld [vmem:[#allocation2 + $0x8] sm:$0xff] }
0x1242   :  { %2090 = vmatmul.msk.f32.gmra.mxu1 %vm179_vm7, %v908_v53  ;;  %2092 = vmatmul.msk.f32.gmra.mxu3 %vm179_vm7, %v908_v53 }
0x124a   :  { %2095 = vmatmul.msk.f32.vlgmr.msrb.gmra.mxu1 %vm975_vm2, %v1078_v0  ;;  %2096 = vmatmul.msk.f32.vlgmr.msrb.gmra.mxu3 %vm975_vm2, %v1078_v0 }
0x124b   :  { %1398 = vmatpush.msrb.mxu1 %v2770_v15 }
0x124d   :  { %1399 = vmatpush.msrb.mxu1 %v2776_v18 }
0x124f   :  { %1400 = vmatpush.msrb.mxu1 %v2779_v19 }
0x1251   :  { %1401 = vmatpush.msrb.mxu1 %v2790_v28 }
0x1253   :  { %1402 = vmatpush.msrb.mxu1 %v2794_v31 }
0x1255   :  { %1403 = vmatpush.msrb.mxu1 %v2797_v33 }
0x1257   :  { %1404 = vmatpush.msrb.mxu1 %v2800_v6 }
0x1259   :  { %1405 = vmatpush.msrb.mxu1 %v2804_v34 }
0x12bf   :  { %v2953_v2 = vpop.f32.mrf.mxu1 }
0x12c5   :  { %v2956_v55 = vpop.f32.mrf.mxu3 }
0x12c7   :  { %v1098_v54 = vpop.f32.mrf.mxu1 }
0x12c8   :  { %v1123_v8 = vrot.slane %v1098_v54, 6 }
0x12ca   :  { %v1127_v15 = vadd.f32 %v1123_v8, %v2904_v26 }
0x12cc   :  { %v2097_v18 = vmul.f32 -1.442695, %v1127_v15 }
0x12cd   :  { %v1118_v56 = vpop.f32.mrf.mxu3 }
0x12ce   :  { %2225 = vpow2.f32 %v2097_v18  ;;  %v1124_v31 = vrot.slane %v1118_v56, 6 }
0x12d0   :  { %v1128_v6 = vadd.f32 %v1124_v31, %v2911_v12 }
0x12d2   :  { %v2098_v35 = vmul.f32 -1.442695, %v1128_v6 }
0x12d4   :  { %v2226_v19 = vpop.eup %2225 }
0x12d5   :  { %v1132_v28 = vadd.f32 1.0, %v2226_v19 }
0x12d7   :  { %2227 = vrcp.f32 %v1132_v28  ;;  %v1144_v7 = vand.u32 2147483648, %v1132_v28  ;;  %v1142_v17 = vand.u32 2147483647, %v1132_v28  ;;  %vm1138_vm7 = vweird.f32 %v1132_v28 }
0x12d8   :  { %2229 = vtanh.f32 %v1128_v6 }
0x12d9   :  { %v1145_v21 = vor.u32 1.1754944e-38, %v1144_v7  ;;  %vm1143_vm4 = vcmp.eq.f32.partialorder %v1142_v17, 8.507059e+37  ;;  %2231 = vpow2.f32 %v2098_v35 }
0x12dd   :  { %v2228_v33 = vpop.eup %2227 }
0x12de   :  { %v1134_v58 = vmul.f32 %v2228_v33, %v1132_v28  ;;  %vm1139_vm6 = vweird.f32 %v2228_v33  ;;  %v2230_v27 = vpop.eup %2229 }
0x12df   :  { %vm1140_vm3 = vmor %vm1138_vm7, %vm1139_vm6  ;;  %v2232_v37 = vpop.eup %2231 }
0x12e0   :  { %v1135_v63 = vsub.f32 1.0, %v1134_v58  ;;  %v1152_v38 = vadd.f32 1.0, %v2232_v37 }
0x12e2   :  { %v1136_v16 = vmul.f32 %v2228_v33, %v1135_v63  ;;  %2233 = vrcp.f32 %v1152_v38  ;;  %v1164_v51 = vand.u32 2147483648, %v1152_v38  ;;  %vm1158_vm0 = vweird.f32 %v1152_v38 }
0x12e3   :  { %v1162_v52 = vand.u32 2147483647, %v1152_v38 }
0x12e4   :  { %v1137_v20 = vadd.f32 %v2228_v33, %v1136_v16  ;;  %v1165_v36 = vor.u32 1.1754944e-38, %v1164_v51 }
0x12e5   :  { %vm1163_vm8 = vcmp.eq.f32.partialorder %v1162_v52, 8.507059e+37 }
0x12e6   :  { %v1141_v25 = vsel %vm1140_vm3, %v2228_v33, %v1137_v20 }
0x12e7   :  { %v1146_v29 = vsel %vm1143_vm4, %v1145_v21, %v1141_v25 }
0x12e8   :  { %v1172_v30 = vmul.f32 %v2230_v27, %v1146_v29  ;;  %v1171_v32 = vmul.f32 %v1169_v24, %v1146_v29  ;;  %v2234_v10 = vpop.eup %2233 }
0x12e9   :  { %v1154_v44 = vmul.f32 %v2234_v10, %v1152_v38  ;;  %vm1159_vm5 = vweird.f32 %v2234_v10 }
0x12ea   :  { %1174 = vrot.lane.b32.xlu1 %v1172_v30, %s2566_s6  ;;  %vm1160_vm1 = vmor %vm1158_vm0, %vm1159_vm5 }
0x12eb   :  { %v1155_v3 = vsub.f32 1.0, %v1154_v44 }
0x12ed   :  { %v1156_v4 = vmul.f32 %v2234_v10, %v1155_v3  ;;  %v1337_v3 = vld [vmem:[#allocation15 + $0x90] sm:$0xff] }
0x12ef   :  { %v1157_v50 = vadd.f32 %v2234_v10, %v1156_v4 }
0x12f1   :  { %v1161_v57 = vsel %vm1160_vm1, %v2234_v10, %v1157_v50  ;;  %v1340_v10 = vld [vmem:[#allocation15 + $0xa8] sm:$0xff] }
0x12f2   :  { %v1166_v1 = vsel %vm1163_vm8, %v1165_v36, %v1161_v57  ;;  %1359 = vmatpush.msra.mxu0 %v1340_v10 }
0x12f4   :  { %1360 = vmatpush.msra.mxu0 %v1339_v43 }
0x12f6   :  { %1361 = vmatpush.msra.mxu0 %v1338_v45 }
0x12f8   :  { %1362 = vmatpush.msra.mxu0 %v1337_v3  ;;  %v1477_v3 = vld [vmem:[#allocation15 + $0xf8] sm:$0xff] }
0x12f9   :  { %1492 = vmatpush.msrb.mxu3 %v1477_v3 }
0x12fa   :  { %1363 = vmatpush.msra.mxu0 %v1336_v47  ;;  %v1476_v47 = vld [vmem:[#allocation15 + $0xf0] sm:$0xff] }
0x12fb   :  { %1493 = vmatpush.msrb.mxu3 %v1476_v47 }
0x135c   :  { %v1175_v48 = vpop.permute.xlu1 %1174 }
0x135d   :  { %v1177_v49 = vadd.f32 %v1175_v48, %v1171_v32  ;;  %v1335_v48 = vld [vmem:[#allocation15 + $0x80] sm:$0xff] }
0x135e   :  { %1364 = vmatpush.msra.mxu0 %v1335_v48  ;;  %v1474_v48 = vld [vmem:[#allocation15 + $0xe0] sm:$0xff] }
0x135f   :  { %2235 = vtanh.f32 %v1177_v49  ;;  %v1323_v27 = vrot.slane %v1177_v49, 6 }
0x1365   :  { %v2236_v0 = vpop.eup %2235 }
0x1366   :  { %v1179_v53 = vmul.f32 %v2236_v0, %v1166_v1 }
0x1368   :  { %v1190_v54 = vrot.slane %v1179_v53, 2 }
0x136a   :  { %1191 = vrot.lane.b32.xlu2 %v1190_v54, %s2566_s6 }
0x13c4   :  { %v1192_v8 = vpop.permute.xlu2 %1191 }
0x13c5   :  { %2099 = vmatmul.msk.f32.vlgmr.msrb.gmra.mxu0 %vm975_vm2, %v1192_v8  ;;  %2101 = vmatmul.msk.f32.vlgmr.msra.gmra.mxu1 %vm975_vm2, %v1192_v8 }
0x13c6   :  { %2102 = vmatmul.msk.f32.vlgmr.msra.gmra.mxu3 %vm975_vm2, %v1192_v8  ;;  %1513 = vmatpush.msrb.mxu0 %v2854_v59 }
0x13c8   :  { %1514 = vmatpush.msrb.mxu0 %v2856_v60 }
0x13ca   :  { %1515 = vmatpush.msrb.mxu0 %v2860_v61 }
0x13cc   :  { %1516 = vmatpush.msrb.mxu0 %v2864_v62 }
0x13ce   :  { %1517 = vmatpush.msrb.mxu0 %v2871_v9 }
0x13d0   :  { %1518 = vmatpush.msrb.mxu0 %v2873_v11 }
0x13d2   :  { %1519 = vmatpush.msrb.mxu0 %v2877_v13 }
0x13d4   :  { %1520 = vmatpush.msrb.mxu0 %v2881_v14 }
0x1442   :  { %v1252_v15 = vpop.f32.mrf.mxu1 }
0x1443   :  { %v1277_v18 = vrot.slane %v1252_v15, 4 }
0x1445   :  { %v1281_v19 = vadd.f32 %v1277_v18, %v2904_v26 }
0x1447   :  { %v2103_v28 = vmul.f32 -1.442695, %v1281_v19  ;;  %v2983_v19 = vld [vmem:[#allocation12 + $0x78] sm:$0xff] }
0x1449   :  { %2237 = vpow2.f32 %v2103_v28  ;;  %v1272_v33 = vpop.f32.mrf.mxu3  ;;  %v2986_v28 = vld [vmem:[#allocation12 + $0x68] sm:$0xff] }
0x144a   :  { %v1278_v6 = vrot.slane %v1272_v33, 4  ;;  %v2995_v33 = vld [vmem:[#allocation12 + $0x38] sm:$0xff] }
0x144c   :  { %v1282_v63 = vadd.f32 %v1278_v6, %v2911_v12  ;;  %v2998_v6 = vld [vmem:[#allocation12 + $0x28] sm:$0xff] }
0x144e   :  { %v2104_v38 = vmul.f32 -1.442695, %v1282_v63 }
0x144f   :  { %v2238_v56 = vpop.eup %2237 }
0x1450   :  { %v1286_v31 = vadd.f32 1.0, %v2238_v56  ;;  %v2989_v56 = vld [vmem:[#allocation12 + $0x58] sm:$0xff] }
0x1452   :  { %2239 = vrcp.f32 %v1286_v31  ;;  %v1298_v17 = vand.u32 2147483648, %v1286_v31  ;;  %v1296_v21 = vand.u32 2147483647, %v1286_v31  ;;  %vm1292_vm10 = vweird.f32 %v1286_v31 }
0x1453   :  { %2241 = vtanh.f32 %v1282_v63  ;;  %v3005_v63 = vpop.f32.mrf.mxu2 }
0x1454   :  { %v1299_v25 = vor.u32 1.1754944e-38, %v1298_v17  ;;  %vm1297_vm12 = vcmp.eq.f32.partialorder %v1296_v21, 8.507059e+37  ;;  %2243 = vpow2.f32 %v2104_v38 }
0x1458   :  { %v2240_v58 = vpop.eup %2239 }
0x1459   :  { %v1288_v7 = vmul.f32 %v2240_v58, %v1286_v31  ;;  %vm1293_vm9 = vweird.f32 %v2240_v58  ;;  %v2242_v30 = vpop.eup %2241  ;;  %v2992_v31 = vld [vmem:[#allocation12 + $0x48] sm:$0xff] }
0x145a   :  { %vm1294_vm11 = vmor %vm1292_vm10, %vm1293_vm9  ;;  %v2244_v39 = vpop.eup %2243 }
0x145b   :  { %v1289_v16 = vsub.f32 1.0, %v1288_v7  ;;  %v1306_v40 = vadd.f32 1.0, %v2244_v39 }
0x145d   :  { %v1290_v20 = vmul.f32 %v2240_v58, %v1289_v16  ;;  %2245 = vrcp.f32 %v1306_v40  ;;  %v1318_v57 = vand.u32 2147483648, %v1306_v40  ;;  %vm1312_vm14 = vweird.f32 %v1306_v40 }
0x145e   :  { %v1316_v36 = vand.u32 2147483647, %v1306_v40 }
0x145f   :  { %v1291_v24 = vadd.f32 %v2240_v58, %v1290_v20  ;;  %v1319_v1 = vor.u32 1.1754944e-38, %v1318_v57  ;;  %v1471_v57 = vld [vmem:[#allocation15 + $0xc8] sm:$0xff] }
0x1460   :  { %vm1317_vm6 = vcmp.eq.f32.partialorder %v1316_v36, 8.507059e+37 }
0x1461   :  { %v1295_v29 = vsel %vm1294_vm11, %v2240_v58, %v1291_v24  ;;  %v3001_v58 = vld [vmem:[#allocation12 + $0x18] sm:$0xff] }
0x1462   :  { %v1300_v32 = vsel %vm1297_vm12, %v1299_v25, %v1295_v29 }
0x1463   :  { %v1326_v35 = vmul.f32 %v2242_v30, %v1300_v32  ;;  %v1325_v37 = vmul.f32 %v1323_v27, %v1300_v32  ;;  %v2246_v44 = vpop.eup %2245 }
0x1464   :  { %v1308_v46 = vmul.f32 %v2246_v44, %v1306_v40  ;;  %vm1313_vm13 = vweird.f32 %v2246_v44 }
0x1465   :  { %1328 = vrot.lane.b32.xlu0 %v1326_v35, %s2566_s6  ;;  %vm1314_vm15 = vmor %vm1312_vm14, %vm1313_vm13 }
0x1466   :  { %v1309_v4 = vsub.f32 1.0, %v1308_v46 }
0x1468   :  { %v1310_v49 = vmul.f32 %v2246_v44, %v1309_v4  ;;  %v1475_v4 = vld [vmem:[#allocation15 + $0xe8] sm:$0xff] }
0x1469   :  { %1494 = vmatpush.msrb.mxu3 %v1475_v4 }
0x146a   :  { %v1311_v52 = vadd.f32 %v2246_v44, %v1310_v49 }
0x146b   :  { %1495 = vmatpush.msrb.mxu3 %v1474_v48 }
0x146c   :  { %v1315_v0 = vsel %vm1314_vm15, %v2246_v44, %v1311_v52  ;;  %v1472_v52 = vld [vmem:[#allocation15 + $0xd0] sm:$0xff] }
0x146d   :  { %v1320_v54 = vsel %vm1317_vm6, %v1319_v1, %v1315_v0  ;;  %v1470_v0 = vld [vmem:[#allocation15 + $0xc0] sm:$0xff] }
0x14d7   :  { %v1329_v50 = vpop.permute.xlu0 %1328 }
0x14d8   :  { %v2970_v51 = vadd.f32 %v1329_v50, %v1325_v37  ;;  %v1473_v50 = vld [vmem:[#allocation15 + $0xd8] sm:$0xff] }
0x14d9   :  { %1496 = vmatpush.msrb.mxu3 %v1473_v50  ;;  %v1606_v50 = vld [vmem:[#allocation15 + $0x138] sm:$0xff] }
0x14da   :  { %2247 = vtanh.f32 %v2970_v51  ;;  %v1458_v40 = vrot.slane %v2970_v51, 6  ;;  %1620 = vmatpush.msra.mxu1 %v1606_v50 }
0x14db   :  { %1497 = vmatpush.msrb.mxu3 %v1472_v52  ;;  %v1604_v52 = vld [vmem:[#allocation15 + $0x128] sm:$0xff] }
0x14dd   :  { %1498 = vmatpush.msrb.mxu3 %v1471_v57  ;;  %v1603_v57 = vld [vmem:[#allocation15 + $0x120] sm:$0xff] }
0x14df   :  { %1499 = vmatpush.msrb.mxu3 %v1470_v0 }
0x14e0   :  { %v2248_v53 = vpop.eup %2247 }
0x14e1   :  { %v1333_v8 = vmul.f32 %v2248_v53, %v1320_v54  ;;  %1641 = vmatpush.msra.mxu3 %v2854_v59 }
0x14e3   :  { %v1344_v15 = vrot.slane %v1333_v8, 4  ;;  %1642 = vmatpush.msra.mxu3 %v2856_v60 }
0x14e5   :  { %1345 = vrot.lane.b32.xlu1 %v1344_v15, %s2566_s6  ;;  %1643 = vmatpush.msra.mxu3 %v2860_v61 }
0x14e7   :  { %1644 = vmatpush.msra.mxu3 %v2864_v62 }
0x14e9   :  { %1645 = vmatpush.msra.mxu3 %v2871_v9 }
0x14eb   :  { %1646 = vmatpush.msra.mxu3 %v2873_v11 }
0x14ed   :  { %1647 = vmatpush.msra.mxu3 %v2877_v13 }
0x14ef   :  { %1648 = vmatpush.msra.mxu3 %v2881_v14 }
0x1557   :  { %v1346_v18 = vpop.permute.xlu1 %1345 }
0x1558   :  { %2105 = vmatmul.msk.f32.vlgmr.msra.gmra.mxu0 %vm975_vm2, %v1346_v18  ;;  %2106 = vmatmul.msk.f32.vlgmr.msra.gmra.mxu2 %vm975_vm2, %v1346_v18 }
0x1559   :  { %2107 = vmatmul.msk.f32.vlgmr.msrb.gmra.mxu1 %vm975_vm2, %v1346_v18  ;;  %1661 = vmatpush.msra.mxu0 %v2983_v19 }
0x155b   :  { %1662 = vmatpush.msra.mxu0 %v2986_v28 }
0x155d   :  { %1663 = vmatpush.msra.mxu0 %v2989_v56 }
0x155f   :  { %1664 = vmatpush.msra.mxu0 %v2992_v31 }
0x1561   :  { %1665 = vmatpush.msra.mxu0 %v2995_v33 }
0x1563   :  { %1666 = vmatpush.msra.mxu0 %v2998_v6 }
0x1565   :  { %1667 = vmatpush.msra.mxu0 %v3001_v58 }
0x1567   :  { %1668 = vmatpush.msra.mxu0 %v2804_v34 }
0x15d6   :  { %v1407_v25 = vpop.f32.mrf.mxu1 }
0x15d7   :  { %v1413_v27 = vrot.slane %v1407_v25, 2 }
0x15d9   :  { %v1417_v30 = vadd.f32 %v1413_v27, %v2911_v12  ;;  %v3033_v27 = vld [vmem:[#allocation12 + $0x8] sm:$0xff] }
0x15db   :  { %v1387_v7 = vpop.f32.mrf.mxu2  ;;  %v2109_v12 = vmul.f32 -1.442695, %v1417_v30 }
0x15dc   :  { %v1412_v16 = vrot.slane %v1387_v7, 2 }
0x15de   :  { %v1416_v17 = vadd.f32 %v1412_v16, %v2904_v26 }
0x15e0   :  { %v2108_v20 = vmul.f32 -1.442695, %v1416_v17 }
0x15e2   :  { %2249 = vpow2.f32 %v2108_v20 }
0x15e8   :  { %v2250_v21 = vpop.eup %2249 }
0x15e9   :  { %v1421_v24 = vadd.f32 1.0, %v2250_v21 }
0x15eb   :  { %2251 = vrcp.f32 %v1421_v24  ;;  %v1433_v34 = vand.u32 2147483648, %v1421_v24  ;;  %v1431_v38 = vand.u32 2147483647, %v1421_v24  ;;  %vm1427_vm3 = vweird.f32 %v1421_v24 }
0x15ec   :  { %2253 = vtanh.f32 %v1417_v30 }
0x15ed   :  { %v1434_v26 = vor.u32 1.1754944e-38, %v1433_v34  ;;  %vm1432_vm5 = vcmp.eq.f32.partialorder %v1431_v38, 8.507059e+37  ;;  %2255 = vpow2.f32 %v2109_v12 }
0x15f1   :  { %v2252_v29 = vpop.eup %2251 }
0x15f2   :  { %v1423_v32 = vmul.f32 %v2252_v29, %v1421_v24  ;;  %vm1428_vm7 = vweird.f32 %v2252_v29  ;;  %v2254_v42 = vpop.eup %2253 }
0x15f3   :  { %vm1429_vm4 = vmor %vm1427_vm3, %vm1428_vm7  ;;  %v2256_v45 = vpop.eup %2255 }
0x15f4   :  { %v1424_v35 = vsub.f32 1.0, %v1423_v32  ;;  %v1441_v46 = vadd.f32 1.0, %v2256_v45  ;;  %v3043_v32 = vadd.f32 %v2953_v2, %v919_v23 }
0x15f6   :  { %v1425_v37 = vmul.f32 %v2252_v29, %v1424_v35  ;;  %2257 = vrcp.f32 %v1441_v46  ;;  %v1453_v15 = vand.u32 2147483648, %v1441_v46  ;;  %vm1447_vm1 = vweird.f32 %v1441_v46 }
0x15f7   :  { %v1451_v18 = vand.u32 2147483647, %v1441_v46 }
0x15f8   :  { %v1426_v39 = vadd.f32 %v2252_v29, %v1425_v37  ;;  %v1454_v16 = vor.u32 1.1754944e-38, %v1453_v15 }
0x15f9   :  { %vm1452_vm9 = vcmp.eq.f32.partialorder %v1451_v18, 8.507059e+37 }
0x15fa   :  { %v1430_v41 = vsel %vm1429_vm4, %v2252_v29, %v1426_v39  ;;  %v3036_v29 = vpop.f32.mrf.mxu0 }
0x15fb   :  { %v1435_v10 = vsel %vm1432_vm5, %v1434_v26, %v1430_v41 }
0x15fc   :  { %v1461_v43 = vmul.f32 %v2254_v42, %v1435_v10  ;;  %v1460_v44 = vmul.f32 %v1458_v40, %v1435_v10  ;;  %v2258_v49 = vpop.eup %2257  ;;  %v3049_v40 = vadd.f32 %v2956_v55, %v920_v5 }
0x15fd   :  { %v1443_v51 = vmul.f32 %v2258_v49, %v1441_v46  ;;  %vm1448_vm0 = vweird.f32 %v2258_v49 }
0x15fe   :  { %1463 = vrot.lane.b32.xlu2 %v1461_v43, %s2566_s6  ;;  %vm1449_vm8 = vmor %vm1447_vm1, %vm1448_vm0 }
0x15ff   :  { %v1444_v36 = vsub.f32 1.0, %v1443_v51  ;;  %v1605_v51 = vld [vmem:[#allocation15 + $0x130] sm:$0xff] }
0x1600   :  { %1621 = vmatpush.msra.mxu1 %v1605_v51  ;;  %v1733_v51 = vld [vmem:[#allocation15 + $0x140] sm:$0xff] }
0x1601   :  { %v1445_v1 = vmul.f32 %v2258_v49, %v1444_v36  ;;  %v1602_v36 = vld [vmem:[#allocation15 + $0x118] sm:$0xff] }
0x1602   :  { %v3038_v30 = vpop.f32.mrf.mxu0  ;;  %1622 = vmatpush.msra.mxu1 %v1604_v52 }
0x1603   :  { %v1446_v8 = vadd.f32 %v2258_v49, %v1445_v1  ;;  %v1601_v1 = vld [vmem:[#allocation15 + $0x110] sm:$0xff] }
0x1604   :  { %1623 = vmatpush.msra.mxu1 %v1603_v57  ;;  %v2317_v57 = vld [vmem:[#allocation12 + $0x70] sm:$0xff] }
0x1605   :  { %v1450_v7 = vsel %vm1449_vm8, %v2258_v49, %v1446_v8  ;;  %v1599_v8 = vld [vmem:[#allocation15 + $0x100] sm:$0xff] }
0x1606   :  { %v1455_v20 = vsel %vm1452_vm9, %v1454_v16, %v1450_v7  ;;  %1624 = vmatpush.msra.mxu1 %v1602_v36 }
0x1608   :  { %1625 = vmatpush.msra.mxu1 %v1601_v1 }
0x1658   :  { %v1464_v53 = vpop.permute.xlu2 %1463 }
0x1659   :  { %v3013_v54 = vadd.f32 %v1464_v53, %v1460_v44 }
0x165b   :  { %2259 = vtanh.f32 %v3013_v54  ;;  %v1587_v46 = vrot.slane %v3013_v54, 6  ;;  %v1600_v54 = vld [vmem:[#allocation15 + $0x108] sm:$0xff] }
0x165c   :  { %1626 = vmatpush.msra.mxu1 %v1600_v54  ;;  %v2319_v54 = vld [vmem:[#allocation12 + $0x50] sm:$0xff] }
0x165e   :  { %1627 = vmatpush.msra.mxu1 %v1599_v8 }
0x1660   :  { %1776 = vmatpush.msrb.mxu1 %v2854_v59 }
0x1661   :  { %v2260_v17 = vpop.eup %2259 }
0x1662   :  { %v1468_v21 = vmul.f32 %v2260_v17, %v1455_v20  ;;  %1777 = vmatpush.msrb.mxu1 %v2856_v60 }
0x1664   :  { %v1479_v24 = vrot.slane %v1468_v21, 6  ;;  %1778 = vmatpush.msrb.mxu1 %v2860_v61 }
0x1666   :  { %1480 = vrot.lane.b32.xlu0 %v1479_v24, %s2566_s6  ;;  %1779 = vmatpush.msrb.mxu1 %v2864_v62 }
0x1668   :  { %1780 = vmatpush.msrb.mxu1 %v2871_v9 }
0x166a   :  { %1781 = vmatpush.msrb.mxu1 %v2873_v11 }
0x166c   :  { %1782 = vmatpush.msrb.mxu1 %v2877_v13 }
0x166e   :  { %1783 = vmatpush.msrb.mxu1 %v2881_v14 }
0x16d8   :  { %v1481_v25 = vpop.permute.xlu0 %1480 }
0x16d9   :  { %2110 = vmatmul.msk.f32.vlgmr.msrb.gmra.mxu3 %vm975_vm2, %v1481_v25  ;;  %2111 = vmatmul.msk.f32.vlgmr.msrb.gmra.mxu0 %vm975_vm2, %v1481_v25 }
0x16da   :  { %2112 = vmatmul.msk.f32.vlgmr.msrb.gmra.mxu2 %vm975_vm2, %v1481_v25  ;;  %1796 = vmatpush.msrb.mxu3 %v2983_v19 }
0x16dc   :  { %1797 = vmatpush.msrb.mxu3 %v2986_v28 }
0x16de   :  { %1798 = vmatpush.msrb.mxu3 %v2989_v56 }
0x16e0   :  { %1799 = vmatpush.msrb.mxu3 %v2992_v31 }
0x16e2   :  { %1800 = vmatpush.msrb.mxu3 %v2995_v33 }
0x16e4   :  { %1801 = vmatpush.msrb.mxu3 %v2998_v6 }
0x16e6   :  { %1802 = vmatpush.msrb.mxu3 %v3001_v58 }
0x16e8   :  { %1803 = vmatpush.msrb.mxu3 %v3033_v27 }
0x1756   :  { %v1522_v35 = vpop.f32.mrf.mxu0 }
0x1757   :  { %v1545_v34 = vadd.f32 %v1522_v35, %v3043_v32 }
0x1759   :  { %v2113_v37 = vmul.f32 -1.442695, %v1545_v34 }
0x175b   :  { %2261 = vpow2.f32 %v2113_v37 }
0x175c   :  { %v3077_v9 = vpop.f32.mrf.mxu3 }
0x175d   :  { %v1542_v26 = vpop.f32.mrf.mxu2 }
0x175e   :  { %v1546_v42 = vadd.f32 %v1542_v26, %v3049_v40 }
0x1760   :  { %v2114_v4 = vmul.f32 -1.442695, %v1546_v42 }
0x1761   :  { %v2262_v38 = vpop.eup %2261 }
0x1762   :  { %v1550_v39 = vadd.f32 1.0, %v2262_v38 }
0x1764   :  { %2263 = vrcp.f32 %v1550_v39  ;;  %v1562_v2 = vand.u32 2147483648, %v1550_v39  ;;  %v1560_v44 = vand.u32 2147483647, %v1550_v39  ;;  %vm1556_vm11 = vweird.f32 %v1550_v39 }
0x1765   :  { %2265 = vtanh.f32 %v1546_v42 }
0x1766   :  { %v1563_v45 = vor.u32 1.1754944e-38, %v1562_v2  ;;  %vm1561_vm13 = vcmp.eq.f32.partialorder %v1560_v44, 8.507059e+37  ;;  %2267 = vpow2.f32 %v2114_v4 }
0x176a   :  { %v2264_v41 = vpop.eup %2263 }
0x176b   :  { %v1552_v10 = vmul.f32 %v2264_v41, %v1550_v39  ;;  %vm1557_vm10 = vweird.f32 %v2264_v41  ;;  %v2266_v5 = vpop.eup %2265 }
0x176c   :  { %vm1558_vm12 = vmor %vm1556_vm11, %vm1557_vm10  ;;  %v2268_v48 = vpop.eup %2267 }
0x176d   :  { %v1553_v23 = vsub.f32 1.0, %v1552_v10  ;;  %v1570_v49 = vadd.f32 1.0, %v2268_v48  ;;  %v1735_v48 = vld [vmem:[#allocation15 + $0x150] sm:$0xff] }
0x176f   :  { %v1554_v43 = vmul.f32 %v2264_v41, %v1553_v23  ;;  %2269 = vrcp.f32 %v1570_v49  ;;  %v1582_v20 = vand.u32 2147483648, %v1570_v49  ;;  %vm1576_vm15 = vweird.f32 %v1570_v49 }
0x1770   :  { %v1580_v21 = vand.u32 2147483647, %v1570_v49 }
0x1771   :  { %v1555_v12 = vadd.f32 %v2264_v41, %v1554_v43  ;;  %v1583_v60 = vor.u32 1.1754944e-38, %v1582_v20  ;;  %v2322_v20 = vld [vmem:[#allocation12 + $0x20] sm:$0xff] }
0x1772   :  { %vm1581_vm7 = vcmp.eq.f32.partialorder %v1580_v21, 8.507059e+37 }
0x1773   :  { %v1559_v22 = vsel %vm1558_vm12, %v2264_v41, %v1555_v12 }
0x1774   :  { %v1564_v55 = vsel %vm1561_vm13, %v1563_v45, %v1559_v22  ;;  %v1739_v22 = vld [vmem:[#allocation15 + $0x170] sm:$0xff] }
0x1775   :  { %v1590_v3 = vmul.f32 %v2266_v5, %v1564_v55  ;;  %v1589_v47 = vmul.f32 %v1587_v46, %v1564_v55  ;;  %v2270_v0 = vpop.eup %2269  ;;  %v1740_v46 = vld [vmem:[#allocation15 + $0x178] sm:$0xff]  ;;  %v1738_v5 = vld [vmem:[#allocation15 + $0x168] sm:$0xff]  ;;  %v1737_v55 = vld [vmem:[#allocation15 + $0x160] sm:$0xff] }
0x1776   :  { %v1572_v53 = vmul.f32 %v2270_v0, %v1570_v49  ;;  %vm1577_vm14 = vweird.f32 %v2270_v0  ;;  %1755 = vmatpush.msra.mxu2 %v1740_v46  ;;  %v1734_v49 = vld [vmem:[#allocation15 + $0x148] sm:$0xff] }
0x1777   :  { %1592 = vrot.lane.b32.xlu1 %v1590_v3, %s2566_s6  ;;  %vm1578_vm6 = vmor %vm1576_vm15, %vm1577_vm14 }
0x1778   :  { %v1573_v15 = vsub.f32 1.0, %v1572_v53  ;;  %1756 = vmatpush.msra.mxu2 %v1739_v22  ;;  %v1875_v22 = vld [vmem:[#allocation15 + $0x1b8] sm:$0xff] }
0x1779   :  { %1890 = vmatpush.msrb.mxu0 %v1875_v22  ;;  %v2004_v22 = vld [vmem:[#allocation15 + $0x1c8] sm:$0xff] }
0x177a   :  { %v1574_v18 = vmul.f32 %v2270_v0, %v1573_v15  ;;  %1757 = vmatpush.msra.mxu2 %v1738_v5  ;;  %v1874_v5 = vld [vmem:[#allocation15 + $0x1b0] sm:$0xff] }
0x177b   :  { %1891 = vmatpush.msrb.mxu0 %v1874_v5 }
0x177c   :  { %v1575_v17 = vadd.f32 %v2270_v0, %v1574_v18  ;;  %1758 = vmatpush.msra.mxu2 %v1737_v55  ;;  %v2320_v18 = vld [vmem:[#allocation12 + $0x40] sm:$0xff]  ;;  %v1873_v55 = vld [vmem:[#allocation15 + $0x1a8] sm:$0xff] }
0x177d   :  { %1892 = vmatpush.msrb.mxu0 %v1873_v55  ;;  %v2003_v55 = vld [vmem:[#allocation15 + $0x1c0] sm:$0xff] }
0x177e   :  { %v1579_v59 = vsel %vm1578_vm6, %v2270_v0, %v1575_v17  ;;  %v2318_v0 = vld [vmem:[#allocation12 + $0x60] sm:$0xff] }
0x177f   :  { %v1584_v24 = vsel %vm1581_vm7, %v1583_v60, %v1579_v59 }
0x17e9   :  { %v1593_v7 = vpop.permute.xlu1 %1592 }
0x17ea   :  { %v3057_v16 = vadd.f32 %v1593_v7, %v1589_v47  ;;  %v1736_v47 = vld [vmem:[#allocation15 + $0x158] sm:$0xff] }
0x17eb   :  { %1759 = vmatpush.msra.mxu2 %v1736_v47 }
0x17ec   :  { %2271 = vtanh.f32 %v3057_v16  ;;  %v1721_v41 = vrot.slane %v3057_v16, 6  ;;  %v2321_v16 = vld [vmem:[#allocation12 + $0x30] sm:$0xff] }
0x17ed   :  { %1760 = vmatpush.msra.mxu2 %v1735_v48 }
0x17ef   :  { %1761 = vmatpush.msra.mxu2 %v1734_v49  ;;  %v1870_v49 = vld [vmem:[#allocation15 + $0x190] sm:$0xff] }
0x17f1   :  { %1762 = vmatpush.msra.mxu2 %v1733_v51 }
0x17f2   :  { %v2272_v61 = vpop.eup %2271 }
0x17f3   :  { %v1597_v25 = vmul.f32 %v2272_v61, %v1584_v24  ;;  %1911 = vmatpush.msrb.mxu2 %v2317_v57  ;;  %v2323_v61 = vld [vmem:[#allocation12 + $0x10] sm:$0xff] }
0x17f5   :  { %1608 = vrot.lane.b32.xlu2 %v1597_v25, %s2566_s6  ;;  %1912 = vmatpush.msrb.mxu2 %v2318_v0  ;;  %v2324_v25 = vld [vmem:[#allocation12] sm:$0xff] }
0x17f7   :  { %1913 = vmatpush.msrb.mxu2 %v2319_v54 }
0x17f9   :  { %1914 = vmatpush.msrb.mxu2 %v2320_v18 }
0x17fb   :  { %1915 = vmatpush.msrb.mxu2 %v2321_v16 }
0x17fd   :  { %1916 = vmatpush.msrb.mxu2 %v2322_v20 }
0x17ff   :  { %1917 = vmatpush.msrb.mxu2 %v2323_v61 }
0x1801   :  { %1918 = vmatpush.msrb.mxu2 %v2324_v25 }
0x184f   :  { %v1609_v62 = vpop.permute.xlu2 %1608 }
0x1850   :  { %2115 = vmatmul.msk.f32.vlgmr.msra.gmra.mxu1 %vm975_vm2, %v1609_v62  ;;  %2116 = vmatmul.msk.f32.vlgmr.msra.gmra.mxu3 %vm975_vm2, %v1609_v62 }
0x1851   :  { %2117 = vmatmul.msk.f32.vlgmr.msra.gmra.mxu0 %vm975_vm2, %v1609_v62  ;;  %1931 = vmatpush.msra.mxu1 %v2983_v19 }
0x1853   :  { %1932 = vmatpush.msra.mxu1 %v2986_v28 }
0x1855   :  { %1933 = vmatpush.msra.mxu1 %v2989_v56 }
0x1857   :  { %1934 = vmatpush.msra.mxu1 %v2992_v31 }
0x1859   :  { %1935 = vmatpush.msra.mxu1 %v2995_v33 }
0x185b   :  { %1936 = vmatpush.msra.mxu1 %v2998_v6 }
0x185d   :  { %1937 = vmatpush.msra.mxu1 %v3001_v58 }
0x185f   :  { %1938 = vmatpush.msra.mxu1 %v3033_v27 }
0x18ce   :  { %v1670_v35 = vpop.f32.mrf.mxu0 }
0x18cf   :  { %v1676_v31 = vrot.slane %v1670_v35, 6 }
0x18d1   :  { %v1680_v6 = vadd.f32 %v1676_v31, %v3049_v40 }
0x18d3   :  { %v1650_v11 = vpop.f32.mrf.mxu3  ;;  %v2119_v44 = vmul.f32 -1.442695, %v1680_v6 }
0x18d4   :  { %v1675_v13 = vrot.slane %v1650_v11, 6  ;;  %v3090_v11 = vpop.f32.mrf.mxu1 }
0x18d6   :  { %v1679_v14 = vadd.f32 %v1675_v13, %v3043_v32 }
0x18d8   :  { %v2118_v19 = vmul.f32 -1.442695, %v1679_v14 }
0x18da   :  { %2273 = vpow2.f32 %v2118_v19 }
0x18e0   :  { %v2274_v28 = vpop.eup %2273 }
0x18e1   :  { %v1684_v56 = vadd.f32 1.0, %v2274_v28 }
0x18e3   :  { %2275 = vrcp.f32 %v1684_v56  ;;  %v1696_v27 = vand.u32 2147483648, %v1684_v56  ;;  %v1694_v38 = vand.u32 2147483647, %v1684_v56  ;;  %vm1690_vm4 = vweird.f32 %v1684_v56 }
0x18e4   :  { %2277 = vtanh.f32 %v1680_v6 }
0x18e5   :  { %v1697_v26 = vor.u32 1.1754944e-38, %v1696_v27  ;;  %vm1695_vm0 = vcmp.eq.f32.partialorder %v1694_v38, 8.507059e+37  ;;  %2279 = vpow2.f32 %v2119_v44 }
0x18e9   :  { %v2276_v33 = vpop.eup %2275 }
0x18ea   :  { %v1686_v34 = vmul.f32 %v2276_v33, %v1684_v56  ;;  %vm1691_vm3 = vweird.f32 %v2276_v33  ;;  %v2278_v10 = vpop.eup %2277 }
0x18eb   :  { %vm1692_vm5 = vmor %vm1690_vm4, %vm1691_vm3  ;;  %v2280_v12 = vpop.eup %2279 }
0x18ec   :  { %v1687_v58 = vsub.f32 1.0, %v1686_v34  ;;  %v1704_v45 = vadd.f32 1.0, %v2280_v12 }
0x18ee   :  { %v1688_v37 = vmul.f32 %v2276_v33, %v1687_v58  ;;  %2281 = vrcp.f32 %v1704_v45  ;;  %v1716_v8 = vand.u32 2147483648, %v1704_v45  ;;  %vm1710_vm8 = vweird.f32 %v1704_v45 }
0x18ef   :  { %v1714_v15 = vand.u32 2147483647, %v1704_v45 }
0x18f0   :  { %v1689_v39 = vadd.f32 %v2276_v33, %v1688_v37  ;;  %v1717_v17 = vor.u32 1.1754944e-38, %v1716_v8 }
0x18f1   :  { %vm1715_vm10 = vcmp.eq.f32.partialorder %v1714_v15, 8.507059e+37 }
0x18f2   :  { %v1693_v42 = vsel %vm1692_vm5, %v2276_v33, %v1689_v39 }
0x18f3   :  { %v1698_v23 = vsel %vm1695_vm0, %v1697_v26, %v1693_v42 }
0x18f4   :  { %v1724_v2 = vmul.f32 %v2278_v10, %v1698_v23  ;;  %v1723_v43 = vmul.f32 %v1721_v41, %v1698_v23  ;;  %v2282_v3 = vpop.eup %2281 }
0x18f5   :  { %v1706_v4 = vmul.f32 %v2282_v3, %v1704_v45  ;;  %vm1711_vm1 = vweird.f32 %v2282_v3 }
0x18f6   :  { %1726 = vrot.lane.b32.xlu0 %v1724_v2, %s2566_s6  ;;  %vm1712_vm9 = vmor %vm1710_vm8, %vm1711_vm1 }
0x18f7   :  { %v1707_v50 = vsub.f32 1.0, %v1706_v4  ;;  %v1871_v4 = vld [vmem:[#allocation15 + $0x198] sm:$0xff] }
0x18f9   :  { %v1708_v52 = vmul.f32 %v2282_v3, %v1707_v50  ;;  %v1869_v50 = vld [vmem:[#allocation15 + $0x188] sm:$0xff] }
0x18fb   :  { %v1709_v53 = vadd.f32 %v2282_v3, %v1708_v52  ;;  %v1868_v52 = vld [vmem:[#allocation15 + $0x180] sm:$0xff] }
0x18fd   :  { %v1713_v7 = vsel %vm1712_vm9, %v2282_v3, %v1709_v53  ;;  %v1872_v3 = vld [vmem:[#allocation15 + $0x1a0] sm:$0xff] }
0x18fe   :  { %v1718_v59 = vsel %vm1715_vm10, %v1717_v17, %v1713_v7  ;;  %1893 = vmatpush.msrb.mxu0 %v1872_v3 }
0x1900   :  { %1894 = vmatpush.msrb.mxu0 %v1871_v4 }
0x1902   :  { %1895 = vmatpush.msrb.mxu0 %v1870_v49 }
0x1904   :  { %1896 = vmatpush.msrb.mxu0 %v1869_v50 }
0x1906   :  { %1897 = vmatpush.msrb.mxu0 %v1868_v52 }
0x1968   :  { %v1727_v36 = vpop.permute.xlu0 %1726 }
0x1969   :  { %v3083_v1 = vadd.f32 %v1727_v36, %v1723_v43 }
0x196b   :  { %2283 = vtanh.f32 %v3083_v1  ;;  %v1856_v42 = vrot.slane %v3083_v1, 6 }
0x1971   :  { %v2284_v21 = vpop.eup %2283 }
0x1972   :  { %v1731_v60 = vmul.f32 %v2284_v21, %v1718_v59 }
0x1974   :  { %v1742_v24 = vrot.slane %v1731_v60, 2 }
0x1976   :  { %1743 = vrot.lane.b32.xlu1 %v1742_v24, %s2566_s6 }
0x19e8   :  { %v1744_v62 = vpop.permute.xlu1 %1743 }
0x19e9   :  { %2120 = vmatmul.msk.f32.vlgmr.msra.gmra.mxu2 %vm975_vm2, %v1744_v62  ;;  %2121 = vmatmul.msk.f32.vlgmr.msrb.gmra.mxu1 %vm975_vm2, %v1744_v62 }
0x19ea   :  { %2122 = vmatmul.msk.f32.vlgmr.msrb.gmra.mxu3 %vm975_vm2, %v1744_v62 }
0x1a66   :  { %v1785_v13 = vpop.f32.mrf.mxu1 }
0x1a67   :  { %v1810_v14 = vrot.slane %v1785_v13, 4 }
0x1a69   :  { %v1814_v19 = vadd.f32 %v1810_v14, %v3043_v32 }
0x1a6b   :  { %v2123_v28 = vmul.f32 -1.442695, %v1814_v19 }
0x1a6c   :  { %v3100_v21 = vpop.f32.mrf.mxu2 }
0x1a6d   :  { %2285 = vpow2.f32 %v2123_v28  ;;  %v1805_v31 = vpop.f32.mrf.mxu3 }
0x1a6e   :  { %v1811_v33 = vrot.slane %v1805_v31, 4 }
0x1a70   :  { %v1815_v34 = vadd.f32 %v1811_v33, %v3049_v40 }
0x1a72   :  { %v2124_v12 = vmul.f32 -1.442695, %v1815_v34 }
0x1a73   :  { %v2286_v56 = vpop.eup %2285 }
0x1a74   :  { %v1819_v35 = vadd.f32 1.0, %v2286_v56 }
0x1a76   :  { %2287 = vrcp.f32 %v1819_v35  ;;  %v1831_v37 = vand.u32 2147483648, %v1819_v35  ;;  %v1829_v39 = vand.u32 2147483647, %v1819_v35  ;;  %vm1825_vm12 = vweird.f32 %v1819_v35 }
0x1a77   :  { %2289 = vtanh.f32 %v1815_v34 }
0x1a78   :  { %v1832_v41 = vor.u32 1.1754944e-38, %v1831_v37  ;;  %vm1830_vm14 = vcmp.eq.f32.partialorder %v1829_v39, 8.507059e+37  ;;  %2291 = vpow2.f32 %v2124_v12  ;;  %v2006_v12 = vld [vmem:[#allocation15 + $0x1d8] sm:$0xff] }
0x1a7c   :  { %v2288_v6 = vpop.eup %2287 }
0x1a7d   :  { %v1821_v58 = vmul.f32 %v2288_v6, %v1819_v35  ;;  %vm1826_vm11 = vweird.f32 %v2288_v6  ;;  %v2290_v23 = vpop.eup %2289 }
0x1a7e   :  { %vm1827_vm13 = vmor %vm1825_vm12, %vm1826_vm11  ;;  %v2292_v45 = vpop.eup %2291 }
0x1a7f   :  { %v1822_v27 = vsub.f32 1.0, %v1821_v58  ;;  %v1839_v46 = vadd.f32 1.0, %v2292_v45 }
0x1a81   :  { %v1823_v38 = vmul.f32 %v2288_v6, %v1822_v27  ;;  %2293 = vrcp.f32 %v1839_v46  ;;  %v1851_v53 = vand.u32 2147483648, %v1839_v46  ;;  %vm1845_vm6 = vweird.f32 %v1839_v46 }
0x1a82   :  { %v1849_v54 = vand.u32 2147483647, %v1839_v46 }
0x1a83   :  { %v1824_v26 = vadd.f32 %v2288_v6, %v1823_v38  ;;  %v1852_v15 = vor.u32 1.1754944e-38, %v1851_v53 }
0x1a84   :  { %vm1850_vm3 = vcmp.eq.f32.partialorder %v1849_v54, 8.507059e+37  ;;  %v1233_v54 = vadd.f32 %v3005_v63, %v3036_v29 }
0x1a85   :  { %v1828_v10 = vsel %vm1827_vm13, %v2288_v6, %v1824_v26 }
0x1a86   :  { %v1833_v2 = vsel %vm1830_vm14, %v1832_v41, %v1828_v10  ;;  %v2010_v10 = vld [vmem:[#allocation15 + $0x1f8] sm:$0xff] }
0x1a87   :  { %v1859_v43 = vmul.f32 %v2290_v23, %v1833_v2  ;;  %v1858_v44 = vmul.f32 %v1856_v42, %v1833_v2  ;;  %v2294_v47 = vpop.eup %2293  ;;  %v2009_v23 = vld [vmem:[#allocation15 + $0x1f0] sm:$0xff]  ;;  %2025 = vmatpush.msra.mxu3 %v2010_v10  ;;  %v2008_v2 = vld [vmem:[#allocation15 + $0x1e8] sm:$0xff] }
0x1a88   :  { %v1841_v48 = vmul.f32 %v2294_v47, %v1839_v46  ;;  %vm1846_vm15 = vweird.f32 %v2294_v47  ;;  %v2005_v46 = vld [vmem:[#allocation15 + $0x1d0] sm:$0xff] }
0x1a89   :  { %1861 = vrot.lane.b32.xlu2 %v1859_v43, %s2566_s6  ;;  %vm1847_vm7 = vmor %vm1845_vm6, %vm1846_vm15  ;;  %2026 = vmatpush.msra.mxu3 %v2009_v23  ;;  %v2007_v43 = vld [vmem:[#allocation15 + $0x1e0] sm:$0xff] }
0x1a8a   :  { %v1842_v51 = vsub.f32 1.0, %v1841_v48 }
0x1a8b   :  { %2027 = vmatpush.msra.mxu3 %v2008_v2 }
0x1a8c   :  { %v1843_v57 = vmul.f32 %v2294_v47, %v1842_v51 }
0x1a8d   :  { %2028 = vmatpush.msra.mxu3 %v2007_v43 }
0x1a8e   :  { %v1844_v1 = vadd.f32 %v2294_v47, %v1843_v57 }
0x1a8f   :  { %2029 = vmatpush.msra.mxu3 %v2006_v12 }
0x1a90   :  { %v1848_v8 = vsel %vm1847_vm7, %v2294_v47, %v1844_v1 }
0x1a91   :  { %v1853_v7 = vsel %vm1850_vm3, %v1852_v15, %v1848_v8  ;;  %2030 = vmatpush.msra.mxu3 %v2005_v46  ;;  %v1369_v8 = vadd.f32 %v3038_v30, %v1233_v54 }
0x1a93   :  { %2031 = vmatpush.msra.mxu3 %v2004_v22  ;;  %v1504_v15 = vadd.f32 %v3077_v9, %v1369_v8 }
0x1a95   :  { %2032 = vmatpush.msra.mxu3 %v2003_v55 }
0x1ae3   :  { %v1862_v36 = vpop.permute.xlu2 %1861 }
0x1ae4   :  { %v1864_v0 = vadd.f32 %v1862_v36, %v1858_v44 }
0x1ae6   :  { %2295 = vtanh.f32 %v1864_v0  ;;  %v1991_v58 = vrot.slane %v1864_v0, 6 }
0x1aec   :  { %v2296_v18 = vpop.eup %2295 }
0x1aed   :  { %v1866_v16 = vmul.f32 %v2296_v18, %v1853_v7  ;;  %v1632_v18 = vadd.f32 %v3090_v11, %v1504_v15 }
0x1aef   :  { %v1877_v17 = vrot.slane %v1866_v16, 4  ;;  %v1767_v16 = vadd.f32 %v3100_v21, %v1632_v18 }
0x1af1   :  { %1878 = vrot.lane.b32.xlu0 %v1877_v17, %s2566_s6 }
0x1b63   :  { %v1879_v20 = vpop.permute.xlu0 %1878 }
0x1b64   :  { %2125 = vmatmul.msk.f32.vlgmr.msrb.gmra.mxu0 %vm975_vm2, %v1879_v20  ;;  %2126 = vmatmul.msk.f32.vlgmr.msrb.gmra.mxu2 %vm975_vm2, %v1879_v20 }
0x1b65   :  { %2127 = vmatmul.msk.f32.vlgmr.msra.gmra.mxu1 %vm975_vm2, %v1879_v20  ;;  %v2148_v20 = vld [vmem:[%s3127_s8] ss:$0 sm:$0xff] }
0x1be1   :  { %v1899_v7 = vpop.f32.mrf.mxu0 }
0x1be2   :  { %v1940_v13 = vpop.f32.mrf.mxu1  ;;  %v1902_v17 = vadd.f32 %v1899_v7, %v1767_v16 }
0x1be3   :  { %v1946_v14 = vrot.slane %v1940_v13, 2 }
0x1be5   :  { %v1950_v28 = vadd.f32 %v1946_v14, %v3049_v40 }
0x1be7   :  { %v1920_v59 = vpop.f32.mrf.mxu2  ;;  %v2129_v40 = vmul.f32 -1.442695, %v1950_v28 }
0x1be8   :  { %v1945_v60 = vrot.slane %v1920_v59, 2 }
0x1bea   :  { %v1949_v61 = vadd.f32 %v1945_v60, %v3043_v32 }
0x1bec   :  { %v2128_v24 = vmul.f32 -1.442695, %v1949_v61 }
0x1bee   :  { %2297 = vpow2.f32 %v2128_v24 }
0x1bf4   :  { %v2298_v25 = vpop.eup %2297 }
0x1bf5   :  { %v1954_v62 = vadd.f32 1.0, %v2298_v25 }
0x1bf7   :  { %2299 = vrcp.f32 %v1954_v62  ;;  %v1966_v31 = vand.u32 2147483648, %v1954_v62  ;;  %v1964_v6 = vand.u32 2147483647, %v1954_v62  ;;  %vm1960_vm5 = vweird.f32 %v1954_v62 }
0x1bf8   :  { %2301 = vtanh.f32 %v1950_v28 }
0x1bf9   :  { %v1967_v32 = vor.u32 1.1754944e-38, %v1966_v31  ;;  %vm1965_vm1 = vcmp.eq.f32.partialorder %v1964_v6, 8.507059e+37  ;;  %2303 = vpow2.f32 %v2129_v40 }
0x1bfd   :  { %v2300_v19 = vpop.eup %2299 }
0x1bfe   :  { %v1956_v56 = vmul.f32 %v2300_v19, %v1954_v62  ;;  %vm1961_vm4 = vweird.f32 %v2300_v19  ;;  %v2302_v37 = vpop.eup %2301 }
0x1bff   :  { %vm1962_vm0 = vmor %vm1960_vm5, %vm1961_vm4  ;;  %v2304_v41 = vpop.eup %2303 }
0x1c00   :  { %v1957_v35 = vsub.f32 1.0, %v1956_v56  ;;  %v1974_v42 = vadd.f32 1.0, %v2304_v41 }
0x1c02   :  { %v1958_v33 = vmul.f32 %v2300_v19, %v1957_v35  ;;  %2305 = vrcp.f32 %v1974_v42  ;;  %v1986_v49 = vand.u32 2147483648, %v1974_v42  ;;  %vm1980_vm9 = vweird.f32 %v1974_v42 }
0x1c03   :  { %v1984_v50 = vand.u32 2147483647, %v1974_v42 }
0x1c04   :  { %v1959_v34 = vadd.f32 %v2300_v19, %v1958_v33  ;;  %v1987_v52 = vor.u32 1.1754944e-38, %v1986_v49 }
0x1c05   :  { %vm1985_vm11 = vcmp.eq.f32.partialorder %v1984_v50, 8.507059e+37 }
0x1c06   :  { %v1963_v27 = vsel %vm1962_vm0, %v2300_v19, %v1959_v34 }
0x1c07   :  { %v1968_v38 = vsel %vm1965_vm1, %v1967_v32, %v1963_v27 }
0x1c08   :  { %v1994_v39 = vmul.f32 %v2302_v37, %v1968_v38  ;;  %v1993_v26 = vmul.f32 %v1991_v58, %v1968_v38  ;;  %v2306_v44 = vpop.eup %2305 }
0x1c09   :  { %v1976_v45 = vmul.f32 %v2306_v44, %v1974_v42  ;;  %vm1981_vm8 = vweird.f32 %v2306_v44 }
0x1c0a   :  { %1996 = vrot.lane.b32.xlu1 %v1994_v39, %s2566_s6  ;;  %vm1982_vm10 = vmor %vm1980_vm9, %vm1981_vm8 }
0x1c0b   :  { %v1977_v5 = vsub.f32 1.0, %v1976_v45 }
0x1c0d   :  { %v1978_v3 = vmul.f32 %v2306_v44, %v1977_v5 }
0x1c0f   :  { %v1979_v48 = vadd.f32 %v2306_v44, %v1978_v3 }
0x1c11   :  { %v1983_v51 = vsel %vm1982_vm10, %v2306_v44, %v1979_v48 }
0x1c12   :  { %v1988_v36 = vsel %vm1985_vm11, %v1987_v52, %v1983_v51 }
0x1c7c   :  { %v1997_v47 = vpop.permute.xlu1 %1996 }
0x1c7d   :  { %v1999_v4 = vadd.f32 %v1997_v47, %v1993_v26 }
0x1c7f   :  { %2307 = vtanh.f32 %v1999_v4 }
0x1c85   :  { %v2308_v57 = vpop.eup %2307 }
0x1c86   :  { %v2001_v0 = vmul.f32 %v2308_v57, %v1988_v36 }
0x1c88   :  { %v2012_v1 = vrot.slane %v2001_v0, 6 }
0x1c8a   :  { %2013 = vrot.lane.b32.xlu2 %v2012_v1, %s2566_s6 }
0x1ce4   :  { %v2014_v53 = vpop.permute.xlu2 %2013 }
0x1ce5   :  { %2130 = vmatmul.msk.f32.vlgmr.msra.gmra.mxu3 %vm975_vm2, %v2014_v53  ;;  %vm2043_vm2 = vcmask 74752  }
0x1d68   :  { %v2034_v59 = vpop.f32.mrf.mxu3 }
0x1d69   :  { %v2037_v63 = vadd.f32 %v2034_v59, %v1902_v17 }
0x1d6b   :  { %v2042_v29 = vadd.f32 %v2148_v20, %v2037_v63 }
0x1d6d   :  { %2044 = vst.msk [vmem:[#allocation17] sm:$0x3] %vm2043_vm2, %v2042_v29 }
0x1d6e   :  { %2055 = dma.vmem_to_hbm [thread:$0]  %s2051_s27, 32, %s2053_s30, [#allocation5]  }
0x1d6f   :  { %2551 = dma.done.wait [#allocation5], 32  }
0x1d70   :  { %2552 = vsyncadd [#allocation5], 4294967264 }
0x1d71   :  { %2060 = vsyncpa [#allocation4], 1 }
0x1d72   :  { %2061 = vsyncpa [#allocation7], 1 }
0x1d73   :  { %2062 = vsyncpa [#allocation10], 1 }
0x1d74   :  { %2063 = vsyncpa [#allocation13], 1 }
0x1d75   :  { %2064 = vsyncpa [#allocation16], 1 }
0x1d76   :  { %2065 = vsyncpa [#allocation5], 1 }

</bundles_post_ra>
